<compile_context>
chip_gen: v5e
topology: v5e:2x2
jax: 0.10.0
libtpu: 0.0.40
codegen_flags: <defaults>
</compile_context>

<pallas_src>
import functools

import jax
import jax.numpy as jnp
import numpy as np
from jax.experimental import pallas as pl
from jax.experimental.pallas import tpu as pltpu

# Stand-ins for the `hp` hyperparameters referenced by the PyTorch module.
HIDDEN = 32          # hp.HIDDEN_LAYER_DIM
LAYERS = 2           # hp.DECODER_LAYERS
VOCAB = 64           # output_size (and embedding vocab)
SEQ = 8              # encoder sequence length
BATCH = 8            # multiples of 8 fill vreg sublanes
STEPS = 6            # number of fused decode steps in the demo
DROPOUT = 0.1        # hp.DROPOUT -- identity at inference (see TODO below)


def _softmax_lastdim(x):
    m = jnp.max(x, axis=-1, keepdims=True)
    e = jnp.exp(x - m)
    denom = jnp.sum(e, axis=-1, keepdims=True)
    # EUP reciprocal: moves the divide off the VPU (only slot with any pressure).
    return e * pl.reciprocal(denom, approx=True)


def decoder_kernel(tok_ref,                       # SMEM (T, B) int32 (scalar prefetch)
                   emb_ref, h0_ref, enc_ref,      # VMEM-resident across all steps
                   w_ih_ref, w_hh_ref, b_ih_ref, b_hh_ref,
                   wc_ref, bc_ref, wo_ref, bo_ref,
                   out_ref, hid_ref,              # outputs; hid_ref is also the carry
                   x_scr,                         # (B, H) VMEM scratch (embedded tokens)
                   *, hidden, layers, batch):
    H, L, B = hidden, layers, batch
    t = pl.program_id(0)

    # Load the initial hidden state into the resident output buffer once.
    @pl.when(t == 0)
    def _():
        hid_ref[...] = h0_ref[...]

    # ---- embedding gather: SMEM token id -> single VMEM row read per batch elem ----
    # TODO(synk): embedding_dropout / inter-layer GRU dropout omitted (inference semantics).
    for b in range(B):                                   # static unroll (tiny B)
        tok = tok_ref[t, b]
        x_scr[pl.ds(b, 1), :] = emb_ref[pl.ds(tok, 1), :]
    x = x_scr[...]                                       # (B, H)

    # ---- stacked GRU, single time step; per-gate weights (all lane offset 0) ----
    for l in range(L):                                   # static unroll over layers
        h_prev = hid_ref[l]                              # (B, H)
        gi_r = jnp.dot(x, w_ih_ref[l, 0], preferred_element_type=jnp.float32) + b_ih_ref[l, 0]
        gi_z = jnp.dot(x, w_ih_ref[l, 1], preferred_element_type=jnp.float32) + b_ih_ref[l, 1]
        gi_n = jnp.dot(x, w_ih_ref[l, 2], preferred_element_type=jnp.float32) + b_ih_ref[l, 2]
        gh_r = jnp.dot(h_prev, w_hh_ref[l, 0], preferred_element_type=jnp.float32) + b_hh_ref[l, 0]
        gh_z = jnp.dot(h_prev, w_hh_ref[l, 1], preferred_element_type=jnp.float32) + b_hh_ref[l, 1]
        gh_n = jnp.dot(h_prev, w_hh_ref[l, 2], preferred_element_type=jnp.float32) + b_hh_ref[l, 2]
        r = jax.nn.sigmoid(gi_r + gh_r)
        z = jax.nn.sigmoid(gi_z + gh_z)
        n = jnp.tanh(gi_n + r * gh_n)                    # r applied to full gh_n (PyTorch GRU)
        h_new = (1.0 - z) * n + z * h_prev               # (B, H)
        hid_ref[l] = h_new                               # carry for next step / final output
        x = h_new
    rnn_out = x                                          # (B, H)

    # ---- Luong "dot" attention over encoder outputs (batched dots on the MXU) ----
    enc = enc_ref[...]                                   # (B, S, H)
    scores = jnp.einsum("bqh,bsh->bqs", rnn_out[:, None, :], enc,
                        preferred_element_type=jnp.float32)[:, 0, :]       # (B, S)
    attn = _softmax_lastdim(scores)                                        # (B, S)
    context = jnp.einsum("bqs,bsh->bqh", attn[:, None, :], enc,
                         preferred_element_type=jnp.float32)[:, 0, :]      # (B, H)

    # ---- concat linear (split into two lane-aligned halves) + tanh ----
    pre = (jnp.dot(rnn_out, wc_ref[0], preferred_element_type=jnp.float32)
           + jnp.dot(context, wc_ref[1], preferred_element_type=jnp.float32)
           + bc_ref[...])
    concat_out = jnp.tanh(pre)                           # (B, H)

    # ---- output projection (vocab padded to 128 lanes -> dense stores) + softmax ----
    logits = jnp.dot(concat_out, wo_ref[...],
                     preferred_element_type=jnp.float32) + bo_ref[...]     # (B, Vp)
    out_ref[0] = _softmax_lastdim(logits)


def _pad_vocab(w_o, b_o):
    V = w_o.shape[-1]
    Vp = ((V + 127) // 128) * 128
    w_o_p = jnp.pad(w_o, ((0, 0), (0, Vp - V)))
    # Padded lanes get a huge negative bias -> exp underflows to 0, no prob mass.
    b_o_p = jnp.pad(b_o, ((0, 0), (0, Vp - V)), constant_values=-1e30)
    return w_o_p, b_o_p, V, Vp


def decoder_decode(token_ids, last_hidden, encoder_outputs, params):
    """Run T decode steps in ONE pallas_call (weights VMEM-resident throughout).

    token_ids: (T, B) int32; last_hidden: (L, B, H); encoder_outputs: (S, B, H).
    Returns (probs (T, B, V), final hidden (L, B, H)).
    """
    T, B = token_ids.shape
    L, _, H = last_hidden.shape
    enc_bsh = jnp.transpose(encoder_outputs, (1, 0, 2))       # once per decode, not per step
    w_o_p, b_o_p, V, Vp = _pad_vocab(params["w_o"], params["b_o"])

    kernel = functools.partial(decoder_kernel, hidden=H, layers=L, batch=B)

    def resident(a):
        # Full-array block with a constant block index -> loaded once, stays in VMEM.
        nd = a.ndim
        return pl.BlockSpec(a.shape, lambda t, tok, _nd=nd: (0,) * _nd)

    operands = (params["embedding"], last_hidden, enc_bsh,
                params["w_ih"], params["w_hh"], params["b_ih"], params["b_hh"],
                params["w_c"], params["b_c"], w_o_p, b_o_p)

    grid_spec = pltpu.PrefetchScalarGridSpec(
        num_scalar_prefetch=1,
        grid=(T,),
        in_specs=[resident(a) for a in operands],
        out_specs=(
            pl.BlockSpec((1, B, Vp), lambda t, tok: (t, 0, 0)),   # lane-dense per-step probs
            pl.BlockSpec((L, B, H), lambda t, tok: (0, 0, 0)),    # resident hidden carry
        ),
        scratch_shapes=[pltpu.VMEM((B, H), jnp.float32)],
    )

    probs_p, hidden = pl.pallas_call(
        kernel,
        grid_spec=grid_spec,
        out_shape=(jax.ShapeDtypeStruct((T, B, Vp), jnp.float32),
                   jax.ShapeDtypeStruct((L, B, H), jnp.float32)),
        compiler_params=pltpu.CompilerParams(dimension_semantics=("arbitrary",)),
    )(token_ids.astype(jnp.int32), *operands)

    return probs_p[..., :V], hidden


def decoder_forward(input_step, last_hidden, encoder_outputs, params):
    """Single decode step with the original PyTorch forward() contract.

    input_step: (1, B) int32 token ids. Returns (probs (B, V), hidden (L, B, H)).
    """
    probs, hidden = decoder_decode(input_step, last_hidden, encoder_outputs, params)
    return probs[0], hidden


def init_params(key):
    ks = jax.random.split(key, 9)
    s = 0.1
    f32 = jnp.float32
    return {
        "embedding": jax.random.normal(ks[0], (VOCAB, HIDDEN), f32) * s,
        # per-gate GRU weights, gate order [r, z, n]; layout is (in, out) for x @ W
        "w_ih": jax.random.normal(ks[1], (LAYERS, 3, HIDDEN, HIDDEN), f32) * s,
        "w_hh": jax.random.normal(ks[2], (LAYERS, 3, HIDDEN, HIDDEN), f32) * s,
        "b_ih": jax.random.normal(ks[3], (LAYERS, 3, 1, HIDDEN), f32) * s,
        "b_hh": jax.random.normal(ks[4], (LAYERS, 3, 1, HIDDEN), f32) * s,
        # concat linear split into [rnn_out half, context half]
        "w_c": jax.random.normal(ks[5], (2, HIDDEN, HIDDEN), f32) * s,
        "b_c": jax.random.normal(ks[6], (1, HIDDEN), f32) * s,
        "w_o": jax.random.normal(ks[7], (HIDDEN, VOCAB), f32) * s,
        "b_o": jax.random.normal(ks[8], (1, VOCAB), f32) * s,
    }


def reference_step(tokens, h, enc_bsh, p):
    """Pure-JAX reference for a single decode step (PyTorch eval semantics)."""
    x = jnp.take(p["embedding"], tokens, axis=0)
    hs = []
    for l in range(h.shape[0]):
        h_prev = h[l]
        gi_r = x @ p["w_ih"][l, 0] + p["b_ih"][l, 0]
        gi_z = x @ p["w_ih"][l, 1] + p["b_ih"][l, 1]
        gi_n = x @ p["w_ih"][l, 2] + p["b_ih"][l, 2]
        gh_r = h_prev @ p["w_hh"][l, 0] + p["b_hh"][l, 0]
        gh_z = h_prev @ p["w_hh"][l, 1] + p["b_hh"][l, 1]
        gh_n = h_prev @ p["w_hh"][l, 2] + p["b_hh"][l, 2]
        r = jax.nn.sigmoid(gi_r + gh_r)
        z = jax.nn.sigmoid(gi_z + gh_z)
        n = jnp.tanh(gi_n + r * gh_n)
        h_new = (1.0 - z) * n + z * h_prev
        hs.append(h_new)
        x = h_new
    rnn_out = x
    scores = jnp.einsum("bh,bsh->bs", rnn_out, enc_bsh)
    attn = jax.nn.softmax(scores, axis=-1)
    context = jnp.einsum("bs,bsh->bh", attn, enc_bsh)
    co = jnp.tanh(rnn_out @ p["w_c"][0] + context @ p["w_c"][1] + p["b_c"])
    logits = co @ p["w_o"] + p["b_o"]
    return jax.nn.softmax(logits, axis=-1), jnp.stack(hs)


def reference_decode(token_ids, h0, encoder_outputs, p):
    enc_bsh = jnp.transpose(encoder_outputs, (1, 0, 2))
    h = h0
    outs = []
    for t in range(token_ids.shape[0]):
        o, h = reference_step(token_ids[t], h, enc_bsh, p)
        outs.append(o)
    return jnp.stack(outs), h


if __name__ == "__main__":
    key = jax.random.PRNGKey(0)
    k_param, k_tok, k_hid, k_enc = jax.random.split(key, 4)

    params = init_params(k_param)
    token_ids = jax.random.randint(k_tok, (STEPS, BATCH), 0, VOCAB, dtype=jnp.int32)
    last_hidden = jax.random.normal(k_hid, (LAYERS, BATCH, HIDDEN), jnp.float32)
    encoder_outputs = jax.random.normal(k_enc, (SEQ, BATCH, HIDDEN), jnp.float32)

    # Fused multi-step decode (one pallas_call for all STEPS tokens).
    probs, hidden = decoder_decode(token_ids, last_hidden, encoder_outputs, params)
    probs, hidden = jax.block_until_ready((probs, hidden))

    ref_probs, ref_hidden = reference_decode(token_ids, last_hidden, encoder_outputs, params)
    # Probability tolerances are loosened to absorb pl.reciprocal(approx=True).
    np.testing.assert_allclose(np.asarray(probs), np.asarray(ref_probs), atol=2e-3, rtol=2e-2)
    np.testing.assert_allclose(np.asarray(hidden), np.asarray(ref_hidden), atol=1e-4, rtol=1e-4)
    np.testing.assert_allclose(np.asarray(probs).sum(axis=-1), 1.0, atol=5e-3)
    assert probs.shape == (STEPS, BATCH, VOCAB) and hidden.shape == (LAYERS, BATCH, HIDDEN)

    # Single-step call with the original PyTorch module's forward() contract.
    out1, hid1 = decoder_forward(token_ids[:1], last_hidden, encoder_outputs, params)
    out1, hid1 = jax.block_until_ready((out1, hid1))
    enc_bsh = jnp.transpose(encoder_outputs, (1, 0, 2))
    ref_o1, ref_h1 = reference_step(token_ids[0], last_hidden, enc_bsh, params)
    np.testing.assert_allclose(np.asarray(out1), np.asarray(ref_o1), atol=2e-3, rtol=2e-2)
    np.testing.assert_allclose(np.asarray(hid1), np.asarray(ref_h1), atol=1e-4, rtol=1e-4)
    assert out1.shape == (BATCH, VOCAB) and hid1.shape == (LAYERS, BATCH, HIDDEN)

    print("KERNEL_OK")
</pallas_src>

<mosaic_0001>
module attributes {stable_mosaic.version = 11 : i64} {
  func.func @decoder_kernel(%arg0: i32, %arg1: memref<6x8xi32, #tpu.memory_space<smem>>, %arg2: memref<64x32xf32, #tpu.memory_space<vmem>>, %arg3: memref<2x8x32xf32, #tpu.memory_space<vmem>>, %arg4: memref<8x8x32xf32, #tpu.memory_space<vmem>>, %arg5: memref<2x3x32x32xf32, #tpu.memory_space<vmem>>, %arg6: memref<2x3x32x32xf32, #tpu.memory_space<vmem>>, %arg7: memref<2x3x1x32xf32, #tpu.memory_space<vmem>>, %arg8: memref<2x3x1x32xf32, #tpu.memory_space<vmem>>, %arg9: memref<2x32x32xf32, #tpu.memory_space<vmem>>, %arg10: memref<1x32xf32, #tpu.memory_space<vmem>>, %arg11: memref<32x128xf32, #tpu.memory_space<vmem>>, %arg12: memref<1x128xf32, #tpu.memory_space<vmem>>, %arg13: memref<1x8x128xf32, #tpu.memory_space<vmem>>, %arg14: memref<2x8x32xf32, #tpu.memory_space<vmem>>, %arg15: memref<8x32xf32, #tpu.memory_space<vmem>>) attributes {dimension_semantics = [#tpu.dimension_semantics<arbitrary>], iteration_bounds = array<i64: 6>, scalar_prefetch = 1 : i64, scratch_operands = 1 : i64, tpu.core_type = #tpu.core_type<tc>, window_params = [{pipeline_mode = #tpu.pipeline_mode<synchronous>, transform_indices = @transform_0, window_bounds = array<i64: 64, 32>}, {pipeline_mode = #tpu.pipeline_mode<synchronous>, transform_indices = @transform_1, window_bounds = array<i64: 2, 8, 32>}, {pipeline_mode = #tpu.pipeline_mode<synchronous>, transform_indices = @transform_2, window_bounds = array<i64: 8, 8, 32>}, {pipeline_mode = #tpu.pipeline_mode<synchronous>, transform_indices = @transform_3, window_bounds = array<i64: 2, 3, 32, 32>}, {pipeline_mode = #tpu.pipeline_mode<synchronous>, transform_indices = @transform_4, window_bounds = array<i64: 2, 3, 32, 32>}, {pipeline_mode = #tpu.pipeline_mode<synchronous>, transform_indices = @transform_5, window_bounds = array<i64: 2, 3, 1, 32>}, {pipeline_mode = #tpu.pipeline_mode<synchronous>, transform_indices = @transform_6, window_bounds = array<i64: 2, 3, 1, 32>}, {pipeline_mode = #tpu.pipeline_mode<synchronous>, transform_indices = @transform_7, window_bounds = array<i64: 2, 32, 32>}, {pipeline_mode = #tpu.pipeline_mode<synchronous>, transform_indices = @transform_8, window_bounds = array<i64: 1, 32>}, {pipeline_mode = #tpu.pipeline_mode<synchronous>, transform_indices = @transform_9, window_bounds = array<i64: 32, 128>}, {pipeline_mode = #tpu.pipeline_mode<synchronous>, transform_indices = @transform_10, window_bounds = array<i64: 1, 128>}, {transform_indices = @transform_11, window_bounds = array<i64: 1, 8, 128>}, {pipeline_mode = #tpu.pipeline_mode<synchronous>, transform_indices = @transform_12, window_bounds = array<i64: 2, 8, 32>}]} {
    %c0_i32 = arith.constant 0 : i32
    %0 = arith.cmpi eq, %arg0, %c0_i32 : i32
    %1 = arith.extui %0 : i1 to i32
    %c0_i32_0 = arith.constant 0 : i32
    %2 = arith.cmpi ne, %1, %c0_i32_0 : i32
    scf.if %2 {
      %c0_179 = arith.constant 0 : index
      %c0_180 = arith.constant 0 : index
      %c0_181 = arith.constant 0 : index
      %224 = vector.load %arg3[%c0_179, %c0_180, %c0_181] : memref<2x8x32xf32, #tpu.memory_space<vmem>>, vector<2x8x32xf32>
      %c0_182 = arith.constant 0 : index
      %c0_183 = arith.constant 0 : index
      %c0_184 = arith.constant 0 : index
      %225 = vector.load %arg14[%c0_182, %c0_183, %c0_184] : memref<2x8x32xf32, #tpu.memory_space<vmem>>, vector<2x8x32xf32>
      tpu.vector_store %arg14[%c0_182, %c0_183, %c0_184], %224 {strides = array<i32>} : memref<2x8x32xf32, #tpu.memory_space<vmem>>, vector<2x8x32xf32>,
    } else {
    }
    %3 = arith.index_cast %arg0 : i32 to index
    %c0 = arith.constant 0 : index
    %4 = memref.load %arg1[%3, %c0] : memref<6x8xi32, #tpu.memory_space<smem>>
    %5 = arith.index_cast %4 : i32 to index
    %c0_1 = arith.constant 0 : index
    %6 = vector.load %arg2[%5, %c0_1] : memref<64x32xf32, #tpu.memory_space<vmem>>, vector<1x32xf32>
    %c0_2 = arith.constant 0 : index
    %c0_3 = arith.constant 0 : index
    %7 = vector.load %arg15[%c0_2, %c0_3] : memref<8x32xf32, #tpu.memory_space<vmem>>, vector<1x32xf32>
    tpu.vector_store %arg15[%c0_2, %c0_3], %6 {strides = array<i32>} : memref<8x32xf32, #tpu.memory_space<vmem>>, vector<1x32xf32>,
    %8 = arith.index_cast %arg0 : i32 to index
    %c1 = arith.constant 1 : index
    %9 = memref.load %arg1[%8, %c1] : memref<6x8xi32, #tpu.memory_space<smem>>
    %10 = arith.index_cast %9 : i32 to index
    %c0_4 = arith.constant 0 : index
    %11 = vector.load %arg2[%10, %c0_4] : memref<64x32xf32, #tpu.memory_space<vmem>>, vector<1x32xf32>
    %c1_5 = arith.constant 1 : index
    %c0_6 = arith.constant 0 : index
    %12 = vector.load %arg15[%c1_5, %c0_6] : memref<8x32xf32, #tpu.memory_space<vmem>>, vector<1x32xf32>
    tpu.vector_store %arg15[%c1_5, %c0_6], %11 {strides = array<i32>} : memref<8x32xf32, #tpu.memory_space<vmem>>, vector<1x32xf32>,
    %13 = arith.index_cast %arg0 : i32 to index
    %c2 = arith.constant 2 : index
    %14 = memref.load %arg1[%13, %c2] : memref<6x8xi32, #tpu.memory_space<smem>>
    %15 = arith.index_cast %14 : i32 to index
    %c0_7 = arith.constant 0 : index
    %16 = vector.load %arg2[%15, %c0_7] : memref<64x32xf32, #tpu.memory_space<vmem>>, vector<1x32xf32>
    %c2_8 = arith.constant 2 : index
    %c0_9 = arith.constant 0 : index
    %17 = vector.load %arg15[%c2_8, %c0_9] : memref<8x32xf32, #tpu.memory_space<vmem>>, vector<1x32xf32>
    tpu.vector_store %arg15[%c2_8, %c0_9], %16 {strides = array<i32>} : memref<8x32xf32, #tpu.memory_space<vmem>>, vector<1x32xf32>,
    %18 = arith.index_cast %arg0 : i32 to index
    %c3 = arith.constant 3 : index
    %19 = memref.load %arg1[%18, %c3] : memref<6x8xi32, #tpu.memory_space<smem>>
    %20 = arith.index_cast %19 : i32 to index
    %c0_10 = arith.constant 0 : index
    %21 = vector.load %arg2[%20, %c0_10] : memref<64x32xf32, #tpu.memory_space<vmem>>, vector<1x32xf32>
    %c3_11 = arith.constant 3 : index
    %c0_12 = arith.constant 0 : index
    %22 = vector.load %arg15[%c3_11, %c0_12] : memref<8x32xf32, #tpu.memory_space<vmem>>, vector<1x32xf32>
    tpu.vector_store %arg15[%c3_11, %c0_12], %21 {strides = array<i32>} : memref<8x32xf32, #tpu.memory_space<vmem>>, vector<1x32xf32>,
    %23 = arith.index_cast %arg0 : i32 to index
    %c4 = arith.constant 4 : index
    %24 = memref.load %arg1[%23, %c4] : memref<6x8xi32, #tpu.memory_space<smem>>
    %25 = arith.index_cast %24 : i32 to index
    %c0_13 = arith.constant 0 : index
    %26 = vector.load %arg2[%25, %c0_13] : memref<64x32xf32, #tpu.memory_space<vmem>>, vector<1x32xf32>
    %c4_14 = arith.constant 4 : index
    %c0_15 = arith.constant 0 : index
    %27 = vector.load %arg15[%c4_14, %c0_15] : memref<8x32xf32, #tpu.memory_space<vmem>>, vector<1x32xf32>
    tpu.vector_store %arg15[%c4_14, %c0_15], %26 {strides = array<i32>} : memref<8x32xf32, #tpu.memory_space<vmem>>, vector<1x32xf32>,
    %28 = arith.index_cast %arg0 : i32 to index
    %c5 = arith.constant 5 : index
    %29 = memref.load %arg1[%28, %c5] : memref<6x8xi32, #tpu.memory_space<smem>>
    %30 = arith.index_cast %29 : i32 to index
    %c0_16 = arith.constant 0 : index
    %31 = vector.load %arg2[%30, %c0_16] : memref<64x32xf32, #tpu.memory_space<vmem>>, vector<1x32xf32>
    %c5_17 = arith.constant 5 : index
    %c0_18 = arith.constant 0 : index
    %32 = vector.load %arg15[%c5_17, %c0_18] : memref<8x32xf32, #tpu.memory_space<vmem>>, vector<1x32xf32>
    tpu.vector_store %arg15[%c5_17, %c0_18], %31 {strides = array<i32>} : memref<8x32xf32, #tpu.memory_space<vmem>>, vector<1x32xf32>,
    %33 = arith.index_cast %arg0 : i32 to index
    %c6 = arith.constant 6 : index
    %34 = memref.load %arg1[%33, %c6] : memref<6x8xi32, #tpu.memory_space<smem>>
    %35 = arith.index_cast %34 : i32 to index
    %c0_19 = arith.constant 0 : index
    %36 = vector.load %arg2[%35, %c0_19] : memref<64x32xf32, #tpu.memory_space<vmem>>, vector<1x32xf32>
    %c6_20 = arith.constant 6 : index
    %c0_21 = arith.constant 0 : index
    %37 = vector.load %arg15[%c6_20, %c0_21] : memref<8x32xf32, #tpu.memory_space<vmem>>, vector<1x32xf32>
    tpu.vector_store %arg15[%c6_20, %c0_21], %36 {strides = array<i32>} : memref<8x32xf32, #tpu.memory_space<vmem>>, vector<1x32xf32>,
    %38 = arith.index_cast %arg0 : i32 to index
    %c7 = arith.constant 7 : index
    %39 = memref.load %arg1[%38, %c7] : memref<6x8xi32, #tpu.memory_space<smem>>
    %40 = arith.index_cast %39 : i32 to index
    %c0_22 = arith.constant 0 : index
    %41 = vector.load %arg2[%40, %c0_22] : memref<64x32xf32, #tpu.memory_space<vmem>>, vector<1x32xf32>
    %c7_23 = arith.constant 7 : index
    %c0_24 = arith.constant 0 : index
    %42 = vector.load %arg15[%c7_23, %c0_24] : memref<8x32xf32, #tpu.memory_space<vmem>>, vector<1x32xf32>
    tpu.vector_store %arg15[%c7_23, %c0_24], %41 {strides = array<i32>} : memref<8x32xf32, #tpu.memory_space<vmem>>, vector<1x32xf32>,
    %c0_25 = arith.constant 0 : index
    %c0_26 = arith.constant 0 : index
    %43 = vector.load %arg15[%c0_25, %c0_26] : memref<8x32xf32, #tpu.memory_space<vmem>>, vector<8x32xf32>
    %c0_27 = arith.constant 0 : index
    %c0_28 = arith.constant 0 : index
    %c0_29 = arith.constant 0 : index
    %44 = vector.load %arg14[%c0_27, %c0_28, %c0_29] : memref<2x8x32xf32, #tpu.memory_space<vmem>>, vector<1x8x32xf32>
    %45 = vector.shape_cast %44 : vector<1x8x32xf32> to vector<8x32xf32>
    %c0_30 = arith.constant 0 : index
    %c0_31 = arith.constant 0 : index
    %c0_32 = arith.constant 0 : index
    %c0_33 = arith.constant 0 : index
    %46 = vector.load %arg5[%c0_30, %c0_31, %c0_32, %c0_33] : memref<2x3x32x32xf32, #tpu.memory_space<vmem>>, vector<1x1x32x32xf32>
    %47 = vector.shape_cast %46 : vector<1x1x32x32xf32> to vector<32x32xf32>
    %cst = arith.constant dense<0.000000e+00> : vector<8x32xf32>
    %48 = tpu.matmul %43, %47, %cst {dimension_numbers = #tpu.dot_dimension_numbers<[1], [0], [0], [1], [0, 0, 1, 1], [], []>} : vector<8x32xf32>, vector<32x32xf32>, vector<8x32xf32> -> vector<8x32xf32>
    %c0_34 = arith.constant 0 : index
    %c0_35 = arith.constant 0 : index
    %c0_36 = arith.constant 0 : index
    %c0_37 = arith.constant 0 : index
    %49 = vector.load %arg7[%c0_34, %c0_35, %c0_36, %c0_37] : memref<2x3x1x32xf32, #tpu.memory_space<vmem>>, vector<1x1x1x32xf32>
    %50 = vector.shape_cast %49 : vector<1x1x1x32xf32> to vector<1x32xf32>
    %51 = vector.broadcast %50 : vector<1x32xf32> to vector<8x32xf32>
    %52 = arith.addf %48, %51 : vector<8x32xf32>
    %c0_38 = arith.constant 0 : index
    %c1_39 = arith.constant 1 : index
    %c0_40 = arith.constant 0 : index
    %c0_41 = arith.constant 0 : index
    %53 = vector.load %arg5[%c0_38, %c1_39, %c0_40, %c0_41] : memref<2x3x32x32xf32, #tpu.memory_space<vmem>>, vector<1x1x32x32xf32>
    %54 = vector.shape_cast %53 : vector<1x1x32x32xf32> to vector<32x32xf32>
    %cst_42 = arith.constant dense<0.000000e+00> : vector<8x32xf32>
    %55 = tpu.matmul %43, %54, %cst_42 {dimension_numbers = #tpu.dot_dimension_numbers<[1], [0], [0], [1], [0, 0, 1, 1], [], []>} : vector<8x32xf32>, vector<32x32xf32>, vector<8x32xf32> -> vector<8x32xf32>
    %c0_43 = arith.constant 0 : index
    %c1_44 = arith.constant 1 : index
    %c0_45 = arith.constant 0 : index
    %c0_46 = arith.constant 0 : index
    %56 = vector.load %arg7[%c0_43, %c1_44, %c0_45, %c0_46] : memref<2x3x1x32xf32, #tpu.memory_space<vmem>>, vector<1x1x1x32xf32>
    %57 = vector.shape_cast %56 : vector<1x1x1x32xf32> to vector<1x32xf32>
    %58 = vector.broadcast %57 : vector<1x32xf32> to vector<8x32xf32>
    %59 = arith.addf %55, %58 : vector<8x32xf32>
    %c0_47 = arith.constant 0 : index
    %c2_48 = arith.constant 2 : index
    %c0_49 = arith.constant 0 : index
    %c0_50 = arith.constant 0 : index
    %60 = vector.load %arg5[%c0_47, %c2_48, %c0_49, %c0_50] : memref<2x3x32x32xf32, #tpu.memory_space<vmem>>, vector<1x1x32x32xf32>
    %61 = vector.shape_cast %60 : vector<1x1x32x32xf32> to vector<32x32xf32>
    %cst_51 = arith.constant dense<0.000000e+00> : vector<8x32xf32>
    %62 = tpu.matmul %43, %61, %cst_51 {dimension_numbers = #tpu.dot_dimension_numbers<[1], [0], [0], [1], [0, 0, 1, 1], [], []>} : vector<8x32xf32>, vector<32x32xf32>, vector<8x32xf32> -> vector<8x32xf32>
    %c0_52 = arith.constant 0 : index
    %c2_53 = arith.constant 2 : index
    %c0_54 = arith.constant 0 : index
    %c0_55 = arith.constant 0 : index
    %63 = vector.load %arg7[%c0_52, %c2_53, %c0_54, %c0_55] : memref<2x3x1x32xf32, #tpu.memory_space<vmem>>, vector<1x1x1x32xf32>
    %64 = vector.shape_cast %63 : vector<1x1x1x32xf32> to vector<1x32xf32>
    %65 = vector.broadcast %64 : vector<1x32xf32> to vector<8x32xf32>
    %66 = arith.addf %62, %65 : vector<8x32xf32>
    %c0_56 = arith.constant 0 : index
    %c0_57 = arith.constant 0 : index
    %c0_58 = arith.constant 0 : index
    %c0_59 = arith.constant 0 : index
    %67 = vector.load %arg6[%c0_56, %c0_57, %c0_58, %c0_59] : memref<2x3x32x32xf32, #tpu.memory_space<vmem>>, vector<1x1x32x32xf32>
    %68 = vector.shape_cast %67 : vector<1x1x32x32xf32> to vector<32x32xf32>
    %cst_60 = arith.constant dense<0.000000e+00> : vector<8x32xf32>
    %69 = tpu.matmul %45, %68, %cst_60 {dimension_numbers = #tpu.dot_dimension_numbers<[1], [0], [0], [1], [0, 0, 1, 1], [], []>} : vector<8x32xf32>, vector<32x32xf32>, vector<8x32xf32> -> vector<8x32xf32>
    %c0_61 = arith.constant 0 : index
    %c0_62 = arith.constant 0 : index
    %c0_63 = arith.constant 0 : index
    %c0_64 = arith.constant 0 : index
    %70 = vector.load %arg8[%c0_61, %c0_62, %c0_63, %c0_64] : memref<2x3x1x32xf32, #tpu.memory_space<vmem>>, vector<1x1x1x32xf32>
    %71 = vector.shape_cast %70 : vector<1x1x1x32xf32> to vector<1x32xf32>
    %72 = vector.broadcast %71 : vector<1x32xf32> to vector<8x32xf32>
    %73 = arith.addf %69, %72 : vector<8x32xf32>
    %c0_65 = arith.constant 0 : index
    %c1_66 = arith.constant 1 : index
    %c0_67 = arith.constant 0 : index
    %c0_68 = arith.constant 0 : index
    %74 = vector.load %arg6[%c0_65, %c1_66, %c0_67, %c0_68] : memref<2x3x32x32xf32, #tpu.memory_space<vmem>>, vector<1x1x32x32xf32>
    %75 = vector.shape_cast %74 : vector<1x1x32x32xf32> to vector<32x32xf32>
    %cst_69 = arith.constant dense<0.000000e+00> : vector<8x32xf32>
    %76 = tpu.matmul %45, %75, %cst_69 {dimension_numbers = #tpu.dot_dimension_numbers<[1], [0], [0], [1], [0, 0, 1, 1], [], []>} : vector<8x32xf32>, vector<32x32xf32>, vector<8x32xf32> -> vector<8x32xf32>
    %c0_70 = arith.constant 0 : index
    %c1_71 = arith.constant 1 : index
    %c0_72 = arith.constant 0 : index
    %c0_73 = arith.constant 0 : index
    %77 = vector.load %arg8[%c0_70, %c1_71, %c0_72, %c0_73] : memref<2x3x1x32xf32, #tpu.memory_space<vmem>>, vector<1x1x1x32xf32>
    %78 = vector.shape_cast %77 : vector<1x1x1x32xf32> to vector<1x32xf32>
    %79 = vector.broadcast %78 : vector<1x32xf32> to vector<8x32xf32>
    %80 = arith.addf %76, %79 : vector<8x32xf32>
    %c0_74 = arith.constant 0 : index
    %c2_75 = arith.constant 2 : index
    %c0_76 = arith.constant 0 : index
    %c0_77 = arith.constant 0 : index
    %81 = vector.load %arg6[%c0_74, %c2_75, %c0_76, %c0_77] : memref<2x3x32x32xf32, #tpu.memory_space<vmem>>, vector<1x1x32x32xf32>
    %82 = vector.shape_cast %81 : vector<1x1x32x32xf32> to vector<32x32xf32>
    %cst_78 = arith.constant dense<0.000000e+00> : vector<8x32xf32>
    %83 = tpu.matmul %45, %82, %cst_78 {dimension_numbers = #tpu.dot_dimension_numbers<[1], [0], [0], [1], [0, 0, 1, 1], [], []>} : vector<8x32xf32>, vector<32x32xf32>, vector<8x32xf32> -> vector<8x32xf32>
    %c0_79 = arith.constant 0 : index
    %c2_80 = arith.constant 2 : index
    %c0_81 = arith.constant 0 : index
    %c0_82 = arith.constant 0 : index
    %84 = vector.load %arg8[%c0_79, %c2_80, %c0_81, %c0_82] : memref<2x3x1x32xf32, #tpu.memory_space<vmem>>, vector<1x1x1x32xf32>
    %85 = vector.shape_cast %84 : vector<1x1x1x32xf32> to vector<1x32xf32>
    %86 = vector.broadcast %85 : vector<1x32xf32> to vector<8x32xf32>
    %87 = arith.addf %83, %86 : vector<8x32xf32>
    %88 = arith.addf %52, %73 : vector<8x32xf32>
    %89 = arith.negf %88 : vector<8x32xf32>
    %90 = math.exp %89 : vector<8x32xf32>
    %cst_83 = arith.constant 1.000000e+00 : f32
    %91 = vector.broadcast %cst_83 : f32 to vector<8x32xf32>
    %92 = arith.addf %91, %90 : vector<8x32xf32>
    %93 = arith.divf %91, %92 : vector<8x32xf32>
    %94 = arith.addf %59, %80 : vector<8x32xf32>
    %95 = arith.negf %94 : vector<8x32xf32>
    %96 = math.exp %95 : vector<8x32xf32>
    %cst_84 = arith.constant 1.000000e+00 : f32
    %97 = vector.broadcast %cst_84 : f32 to vector<8x32xf32>
    %98 = arith.addf %97, %96 : vector<8x32xf32>
    %99 = arith.divf %97, %98 : vector<8x32xf32>
    %100 = arith.mulf %93, %87 : vector<8x32xf32>
    %101 = arith.addf %66, %100 : vector<8x32xf32>
    %102 = math.tanh %101 : vector<8x32xf32>
    %cst_85 = arith.constant 1.000000e+00 : f32
    %103 = vector.broadcast %cst_85 : f32 to vector<8x32xf32>
    %104 = arith.subf %103, %99 : vector<8x32xf32>
    %105 = arith.mulf %104, %102 : vector<8x32xf32>
    %106 = arith.mulf %99, %45 : vector<8x32xf32>
    %107 = arith.addf %105, %106 : vector<8x32xf32>
    %c0_86 = arith.constant 0 : index
    %c0_87 = arith.constant 0 : index
    %c0_88 = arith.constant 0 : index
    %108 = vector.load %arg14[%c0_86, %c0_87, %c0_88] : memref<2x8x32xf32, #tpu.memory_space<vmem>>, vector<1x8x32xf32>
    %109 = vector.shape_cast %108 : vector<1x8x32xf32> to vector<8x32xf32>
    %110 = vector.shape_cast %107 : vector<8x32xf32> to vector<1x8x32xf32>
    tpu.vector_store %arg14[%c0_86, %c0_87, %c0_88], %110 {strides = array<i32>} : memref<2x8x32xf32, #tpu.memory_space<vmem>>, vector<1x8x32xf32>,
    %c1_89 = arith.constant 1 : index
    %c0_90 = arith.constant 0 : index
    %c0_91 = arith.constant 0 : index
    %111 = vector.load %arg14[%c1_89, %c0_90, %c0_91] : memref<2x8x32xf32, #tpu.memory_space<vmem>>, vector<1x8x32xf32>
    %112 = vector.shape_cast %111 : vector<1x8x32xf32> to vector<8x32xf32>
    %c1_92 = arith.constant 1 : index
    %c0_93 = arith.constant 0 : index
    %c0_94 = arith.constant 0 : index
    %c0_95 = arith.constant 0 : index
    %113 = vector.load %arg5[%c1_92, %c0_93, %c0_94, %c0_95] : memref<2x3x32x32xf32, #tpu.memory_space<vmem>>, vector<1x1x32x32xf32>
    %114 = vector.shape_cast %113 : vector<1x1x32x32xf32> to vector<32x32xf32>
    %cst_96 = arith.constant dense<0.000000e+00> : vector<8x32xf32>
    %115 = tpu.matmul %107, %114, %cst_96 {dimension_numbers = #tpu.dot_dimension_numbers<[1], [0], [0], [1], [0, 0, 1, 1], [], []>} : vector<8x32xf32>, vector<32x32xf32>, vector<8x32xf32> -> vector<8x32xf32>
    %c1_97 = arith.constant 1 : index
    %c0_98 = arith.constant 0 : index
    %c0_99 = arith.constant 0 : index
    %c0_100 = arith.constant 0 : index
    %116 = vector.load %arg7[%c1_97, %c0_98, %c0_99, %c0_100] : memref<2x3x1x32xf32, #tpu.memory_space<vmem>>, vector<1x1x1x32xf32>
    %117 = vector.shape_cast %116 : vector<1x1x1x32xf32> to vector<1x32xf32>
    %118 = vector.broadcast %117 : vector<1x32xf32> to vector<8x32xf32>
    %119 = arith.addf %115, %118 : vector<8x32xf32>
    %c1_101 = arith.constant 1 : index
    %c1_102 = arith.constant 1 : index
    %c0_103 = arith.constant 0 : index
    %c0_104 = arith.constant 0 : index
    %120 = vector.load %arg5[%c1_101, %c1_102, %c0_103, %c0_104] : memref<2x3x32x32xf32, #tpu.memory_space<vmem>>, vector<1x1x32x32xf32>
    %121 = vector.shape_cast %120 : vector<1x1x32x32xf32> to vector<32x32xf32>
    %cst_105 = arith.constant dense<0.000000e+00> : vector<8x32xf32>
    %122 = tpu.matmul %107, %121, %cst_105 {dimension_numbers = #tpu.dot_dimension_numbers<[1], [0], [0], [1], [0, 0, 1, 1], [], []>} : vector<8x32xf32>, vector<32x32xf32>, vector<8x32xf32> -> vector<8x32xf32>
    %c1_106 = arith.constant 1 : index
    %c1_107 = arith.constant 1 : index
    %c0_108 = arith.constant 0 : index
    %c0_109 = arith.constant 0 : index
    %123 = vector.load %arg7[%c1_106, %c1_107, %c0_108, %c0_109] : memref<2x3x1x32xf32, #tpu.memory_space<vmem>>, vector<1x1x1x32xf32>
    %124 = vector.shape_cast %123 : vector<1x1x1x32xf32> to vector<1x32xf32>
    %125 = vector.broadcast %124 : vector<1x32xf32> to vector<8x32xf32>
    %126 = arith.addf %122, %125 : vector<8x32xf32>
    %c1_110 = arith.constant 1 : index
    %c2_111 = arith.constant 2 : index
    %c0_112 = arith.constant 0 : index
    %c0_113 = arith.constant 0 : index
    %127 = vector.load %arg5[%c1_110, %c2_111, %c0_112, %c0_113] : memref<2x3x32x32xf32, #tpu.memory_space<vmem>>, vector<1x1x32x32xf32>
    %128 = vector.shape_cast %127 : vector<1x1x32x32xf32> to vector<32x32xf32>
    %cst_114 = arith.constant dense<0.000000e+00> : vector<8x32xf32>
    %129 = tpu.matmul %107, %128, %cst_114 {dimension_numbers = #tpu.dot_dimension_numbers<[1], [0], [0], [1], [0, 0, 1, 1], [], []>} : vector<8x32xf32>, vector<32x32xf32>, vector<8x32xf32> -> vector<8x32xf32>
    %c1_115 = arith.constant 1 : index
    %c2_116 = arith.constant 2 : index
    %c0_117 = arith.constant 0 : index
    %c0_118 = arith.constant 0 : index
    %130 = vector.load %arg7[%c1_115, %c2_116, %c0_117, %c0_118] : memref<2x3x1x32xf32, #tpu.memory_space<vmem>>, vector<1x1x1x32xf32>
    %131 = vector.shape_cast %130 : vector<1x1x1x32xf32> to vector<1x32xf32>
    %132 = vector.broadcast %131 : vector<1x32xf32> to vector<8x32xf32>
    %133 = arith.addf %129, %132 : vector<8x32xf32>
    %c1_119 = arith.constant 1 : index
    %c0_120 = arith.constant 0 : index
    %c0_121 = arith.constant 0 : index
    %c0_122 = arith.constant 0 : index
    %134 = vector.load %arg6[%c1_119, %c0_120, %c0_121, %c0_122] : memref<2x3x32x32xf32, #tpu.memory_space<vmem>>, vector<1x1x32x32xf32>
    %135 = vector.shape_cast %134 : vector<1x1x32x32xf32> to vector<32x32xf32>
    %cst_123 = arith.constant dense<0.000000e+00> : vector<8x32xf32>
    %136 = tpu.matmul %112, %135, %cst_123 {dimension_numbers = #tpu.dot_dimension_numbers<[1], [0], [0], [1], [0, 0, 1, 1], [], []>} : vector<8x32xf32>, vector<32x32xf32>, vector<8x32xf32> -> vector<8x32xf32>
    %c1_124 = arith.constant 1 : index
    %c0_125 = arith.constant 0 : index
    %c0_126 = arith.constant 0 : index
    %c0_127 = arith.constant 0 : index
    %137 = vector.load %arg8[%c1_124, %c0_125, %c0_126, %c0_127] : memref<2x3x1x32xf32, #tpu.memory_space<vmem>>, vector<1x1x1x32xf32>
    %138 = vector.shape_cast %137 : vector<1x1x1x32xf32> to vector<1x32xf32>
    %139 = vector.broadcast %138 : vector<1x32xf32> to vector<8x32xf32>
    %140 = arith.addf %136, %139 : vector<8x32xf32>
    %c1_128 = arith.constant 1 : index
    %c1_129 = arith.constant 1 : index
    %c0_130 = arith.constant 0 : index
    %c0_131 = arith.constant 0 : index
    %141 = vector.load %arg6[%c1_128, %c1_129, %c0_130, %c0_131] : memref<2x3x32x32xf32, #tpu.memory_space<vmem>>, vector<1x1x32x32xf32>
    %142 = vector.shape_cast %141 : vector<1x1x32x32xf32> to vector<32x32xf32>
    %cst_132 = arith.constant dense<0.000000e+00> : vector<8x32xf32>
    %143 = tpu.matmul %112, %142, %cst_132 {dimension_numbers = #tpu.dot_dimension_numbers<[1], [0], [0], [1], [0, 0, 1, 1], [], []>} : vector<8x32xf32>, vector<32x32xf32>, vector<8x32xf32> -> vector<8x32xf32>
    %c1_133 = arith.constant 1 : index
    %c1_134 = arith.constant 1 : index
    %c0_135 = arith.constant 0 : index
    %c0_136 = arith.constant 0 : index
    %144 = vector.load %arg8[%c1_133, %c1_134, %c0_135, %c0_136] : memref<2x3x1x32xf32, #tpu.memory_space<vmem>>, vector<1x1x1x32xf32>
    %145 = vector.shape_cast %144 : vector<1x1x1x32xf32> to vector<1x32xf32>
    %146 = vector.broadcast %145 : vector<1x32xf32> to vector<8x32xf32>
    %147 = arith.addf %143, %146 : vector<8x32xf32>
    %c1_137 = arith.constant 1 : index
    %c2_138 = arith.constant 2 : index
    %c0_139 = arith.constant 0 : index
    %c0_140 = arith.constant 0 : index
    %148 = vector.load %arg6[%c1_137, %c2_138, %c0_139, %c0_140] : memref<2x3x32x32xf32, #tpu.memory_space<vmem>>, vector<1x1x32x32xf32>
    %149 = vector.shape_cast %148 : vector<1x1x32x32xf32> to vector<32x32xf32>
    %cst_141 = arith.constant dense<0.000000e+00> : vector<8x32xf32>
    %150 = tpu.matmul %112, %149, %cst_141 {dimension_numbers = #tpu.dot_dimension_numbers<[1], [0], [0], [1], [0, 0, 1, 1], [], []>} : vector<8x32xf32>, vector<32x32xf32>, vector<8x32xf32> -> vector<8x32xf32>
    %c1_142 = arith.constant 1 : index
    %c2_143 = arith.constant 2 : index
    %c0_144 = arith.constant 0 : index
    %c0_145 = arith.constant 0 : index
    %151 = vector.load %arg8[%c1_142, %c2_143, %c0_144, %c0_145] : memref<2x3x1x32xf32, #tpu.memory_space<vmem>>, vector<1x1x1x32xf32>
    %152 = vector.shape_cast %151 : vector<1x1x1x32xf32> to vector<1x32xf32>
    %153 = vector.broadcast %152 : vector<1x32xf32> to vector<8x32xf32>
    %154 = arith.addf %150, %153 : vector<8x32xf32>
    %155 = arith.addf %119, %140 : vector<8x32xf32>
    %156 = arith.negf %155 : vector<8x32xf32>
    %157 = math.exp %156 : vector<8x32xf32>
    %cst_146 = arith.constant 1.000000e+00 : f32
    %158 = vector.broadcast %cst_146 : f32 to vector<8x32xf32>
    %159 = arith.addf %158, %157 : vector<8x32xf32>
    %160 = arith.divf %158, %159 : vector<8x32xf32>
    %161 = arith.addf %126, %147 : vector<8x32xf32>
    %162 = arith.negf %161 : vector<8x32xf32>
    %163 = math.exp %162 : vector<8x32xf32>
    %cst_147 = arith.constant 1.000000e+00 : f32
    %164 = vector.broadcast %cst_147 : f32 to vector<8x32xf32>
    %165 = arith.addf %164, %163 : vector<8x32xf32>
    %166 = arith.divf %164, %165 : vector<8x32xf32>
    %167 = arith.mulf %160, %154 : vector<8x32xf32>
    %168 = arith.addf %133, %167 : vector<8x32xf32>
    %169 = math.tanh %168 : vector<8x32xf32>
    %cst_148 = arith.constant 1.000000e+00 : f32
    %170 = vector.broadcast %cst_148 : f32 to vector<8x32xf32>
    %171 = arith.subf %170, %166 : vector<8x32xf32>
    %172 = arith.mulf %171, %169 : vector<8x32xf32>
    %173 = arith.mulf %166, %112 : vector<8x32xf32>
    %174 = arith.addf %172, %173 : vector<8x32xf32>
    %c1_149 = arith.constant 1 : index
    %c0_150 = arith.constant 0 : index
    %c0_151 = arith.constant 0 : index
    %175 = vector.load %arg14[%c1_149, %c0_150, %c0_151] : memref<2x8x32xf32, #tpu.memory_space<vmem>>, vector<1x8x32xf32>
    %176 = vector.shape_cast %175 : vector<1x8x32xf32> to vector<8x32xf32>
    %177 = vector.shape_cast %174 : vector<8x32xf32> to vector<1x8x32xf32>
    tpu.vector_store %arg14[%c1_149, %c0_150, %c0_151], %177 {strides = array<i32>} : memref<2x8x32xf32, #tpu.memory_space<vmem>>, vector<1x8x32xf32>,
    %c0_152 = arith.constant 0 : index
    %c0_153 = arith.constant 0 : index
    %c0_154 = arith.constant 0 : index
    %178 = vector.load %arg4[%c0_152, %c0_153, %c0_154] : memref<8x8x32xf32, #tpu.memory_space<vmem>>, vector<8x8x32xf32>
    %179 = vector.shape_cast %174 : vector<8x32xf32> to vector<8x1x32xf32>
    "tpu.trace_start"() <{level = 10 : i32, message = "bqh,bsh->bqs"}> : () -> ()
    %cst_155 = arith.constant dense<0.000000e+00> : vector<8x1x8xf32>
    %180 = tpu.matmul %179, %178, %cst_155 {dimension_numbers = #tpu.dot_dimension_numbers<[2], [2], [1], [1], [0, 0, 0, 1, 1, 1], [0], [0]>} : vector<8x1x32xf32>, vector<8x8x32xf32>, vector<8x1x8xf32> -> vector<8x1x8xf32>
    "tpu.trace_stop"() : () -> ()
    %181 = vector.shape_cast %180 : vector<8x1x8xf32> to vector<8x8xf32>
    %cst_156 = arith.constant dense<0xFF800000> : vector<8xf32>
    %182 = vector.multi_reduction <maximumf>, %181, %cst_156 [1] : vector<8x8xf32> to vector<8xf32>
    %183 = vector.shape_cast %182 : vector<8xf32> to vector<8x1xf32>
    %184 = vector.broadcast %183 : vector<8x1xf32> to vector<8x8xf32>
    %185 = arith.subf %181, %184 : vector<8x8xf32>
    %186 = math.exp %185 : vector<8x8xf32>
    %cst_157 = arith.constant dense<0.000000e+00> : vector<8xf32>
    %187 = vector.multi_reduction <add>, %186, %cst_157 [1] : vector<8x8xf32> to vector<8xf32>
    %188 = vector.shape_cast %187 : vector<8xf32> to vector<8x1xf32>
    %189 = tpu.reciprocal %188 {approx = true} : vector<8x1xf32> -> vector<8x1xf32>
    %190 = vector.broadcast %189 : vector<8x1xf32> to vector<8x8xf32>
    %191 = arith.mulf %186, %190 : vector<8x8xf32>
    %192 = vector.shape_cast %191 : vector<8x8xf32> to vector<8x1x8xf32>
    "tpu.trace_start"() <{level = 10 : i32, message = "bqs,bsh->bqh"}> : () -> ()
    %cst_158 = arith.constant dense<0.000000e+00> : vector<8x1x32xf32>
    %193 = tpu.matmul %192, %178, %cst_158 {dimension_numbers = #tpu.dot_dimension_numbers<[2], [1], [1], [2], [0, 0, 0, 1, 1, 2], [0], [0]>} : vector<8x1x8xf32>, vector<8x8x32xf32>, vector<8x1x32xf32> -> vector<8x1x32xf32>
    "tpu.trace_stop"() : () -> ()
    %194 = vector.shape_cast %193 : vector<8x1x32xf32> to vector<8x32xf32>
    %c0_159 = arith.constant 0 : index
    %c0_160 = arith.constant 0 : index
    %c0_161 = arith.constant 0 : index
    %195 = vector.load %arg9[%c0_159, %c0_160, %c0_161] : memref<2x32x32xf32, #tpu.memory_space<vmem>>, vector<1x32x32xf32>
    %196 = vector.shape_cast %195 : vector<1x32x32xf32> to vector<32x32xf32>
    %cst_162 = arith.constant dense<0.000000e+00> : vector<8x32xf32>
    %197 = tpu.matmul %174, %196, %cst_162 {dimension_numbers = #tpu.dot_dimension_numbers<[1], [0], [0], [1], [0, 0, 1, 1], [], []>} : vector<8x32xf32>, vector<32x32xf32>, vector<8x32xf32> -> vector<8x32xf32>
    %c1_163 = arith.constant 1 : index
    %c0_164 = arith.constant 0 : index
    %c0_165 = arith.constant 0 : index
    %198 = vector.load %arg9[%c1_163, %c0_164, %c0_165] : memref<2x32x32xf32, #tpu.memory_space<vmem>>, vector<1x32x32xf32>
    %199 = vector.shape_cast %198 : vector<1x32x32xf32> to vector<32x32xf32>
    %cst_166 = arith.constant dense<0.000000e+00> : vector<8x32xf32>
    %200 = tpu.matmul %194, %199, %cst_166 {dimension_numbers = #tpu.dot_dimension_numbers<[1], [0], [0], [1], [0, 0, 1, 1], [], []>} : vector<8x32xf32>, vector<32x32xf32>, vector<8x32xf32> -> vector<8x32xf32>
    %201 = arith.addf %197, %200 : vector<8x32xf32>
    %c0_167 = arith.constant 0 : index
    %c0_168 = arith.constant 0 : index
    %202 = vector.load %arg10[%c0_167, %c0_168] : memref<1x32xf32, #tpu.memory_space<vmem>>, vector<1x32xf32>
    %203 = vector.broadcast %202 : vector<1x32xf32> to vector<8x32xf32>
    %204 = arith.addf %201, %203 : vector<8x32xf32>
    %205 = math.tanh %204 : vector<8x32xf32>
    %c0_169 = arith.constant 0 : index
    %c0_170 = arith.constant 0 : index
    %206 = vector.load %arg11[%c0_169, %c0_170] : memref<32x128xf32, #tpu.memory_space<vmem>>, vector<32x128xf32>
    %cst_171 = arith.constant dense<0.000000e+00> : vector<8x128xf32>
    %207 = tpu.matmul %205, %206, %cst_171 {dimension_numbers = #tpu.dot_dimension_numbers<[1], [0], [0], [1], [0, 0, 1, 1], [], []>} : vector<8x32xf32>, vector<32x128xf32>, vector<8x128xf32> -> vector<8x128xf32>
    %c0_172 = arith.constant 0 : index
    %c0_173 = arith.constant 0 : index
    %208 = vector.load %arg12[%c0_172, %c0_173] : memref<1x128xf32, #tpu.memory_space<vmem>>, vector<1x128xf32>
    %209 = vector.broadcast %208 : vector<1x128xf32> to vector<8x128xf32>
    %210 = arith.addf %207, %209 : vector<8x128xf32>
    %cst_174 = arith.constant dense<0xFF800000> : vector<8xf32>
    %211 = vector.multi_reduction <maximumf>, %210, %cst_174 [1] : vector<8x128xf32> to vector<8xf32>
    %212 = vector.shape_cast %211 : vector<8xf32> to vector<8x1xf32>
    %213 = vector.broadcast %212 : vector<8x1xf32> to vector<8x128xf32>
    %214 = arith.subf %210, %213 : vector<8x128xf32>
    %215 = math.exp %214 : vector<8x128xf32>
    %cst_175 = arith.constant dense<0.000000e+00> : vector<8xf32>
    %216 = vector.multi_reduction <add>, %215, %cst_175 [1] : vector<8x128xf32> to vector<8xf32>
    %217 = vector.shape_cast %216 : vector<8xf32> to vector<8x1xf32>
    %218 = tpu.reciprocal %217 {approx = true} : vector<8x1xf32> -> vector<8x1xf32>
    %219 = vector.broadcast %218 : vector<8x1xf32> to vector<8x128xf32>
    %220 = arith.mulf %215, %219 : vector<8x128xf32>
    %c0_176 = arith.constant 0 : index
    %c0_177 = arith.constant 0 : index
    %c0_178 = arith.constant 0 : index
    %221 = vector.load %arg13[%c0_176, %c0_177, %c0_178] : memref<1x8x128xf32, #tpu.memory_space<vmem>>, vector<1x8x128xf32>
    %222 = vector.shape_cast %221 : vector<1x8x128xf32> to vector<8x128xf32>
    %223 = vector.shape_cast %220 : vector<8x128xf32> to vector<1x8x128xf32>
    tpu.vector_store %arg13[%c0_176, %c0_177, %c0_178], %223 {strides = array<i32>} : memref<1x8x128xf32, #tpu.memory_space<vmem>>, vector<1x8x128xf32>,
    return
  }
  func.func @transform_0(%arg0: i32, %arg1: memref<6x8xi32, #tpu.memory_space<smem>>) -> (i32, i32) {
    %c0_i32 = arith.constant 0 : i32
    %c0_i32_0 = arith.constant 0 : i32
    %c0_i32_1 = arith.constant 0 : i32
    return %c0_i32, %c0_i32_0 : i32, i32
  }
  func.func @transform_1(%arg0: i32, %arg1: memref<6x8xi32, #tpu.memory_space<smem>>) -> (i32, i32, i32) {
    %c0_i32 = arith.constant 0 : i32
    %c0_i32_0 = arith.constant 0 : i32
    %c0_i32_1 = arith.constant 0 : i32
    %c0_i32_2 = arith.constant 0 : i32
    return %c0_i32, %c0_i32_0, %c0_i32_1 : i32, i32, i32
  }
  func.func @transform_2(%arg0: i32, %arg1: memref<6x8xi32, #tpu.memory_space<smem>>) -> (i32, i32, i32) {
    %c0_i32 = arith.constant 0 : i32
    %c0_i32_0 = arith.constant 0 : i32
    %c0_i32_1 = arith.constant 0 : i32
    %c0_i32_2 = arith.constant 0 : i32
    return %c0_i32, %c0_i32_0, %c0_i32_1 : i32, i32, i32
  }
  func.func @transform_3(%arg0: i32, %arg1: memref<6x8xi32, #tpu.memory_space<smem>>) -> (i32, i32, i32, i32) {
    %c0_i32 = arith.constant 0 : i32
    %c0_i32_0 = arith.constant 0 : i32
    %c0_i32_1 = arith.constant 0 : i32
    %c0_i32_2 = arith.constant 0 : i32
    %c0_i32_3 = arith.constant 0 : i32
    return %c0_i32, %c0_i32_0, %c0_i32_1, %c0_i32_2 : i32, i32, i32, i32
  }
  func.func @transform_4(%arg0: i32, %arg1: memref<6x8xi32, #tpu.memory_space<smem>>) -> (i32, i32, i32, i32) {
    %c0_i32 = arith.constant 0 : i32
    %c0_i32_0 = arith.constant 0 : i32
    %c0_i32_1 = arith.constant 0 : i32
    %c0_i32_2 = arith.constant 0 : i32
    %c0_i32_3 = arith.constant 0 : i32
    return %c0_i32, %c0_i32_0, %c0_i32_1, %c0_i32_2 : i32, i32, i32, i32
  }
  func.func @transform_5(%arg0: i32, %arg1: memref<6x8xi32, #tpu.memory_space<smem>>) -> (i32, i32, i32, i32) {
    %c0_i32 = arith.constant 0 : i32
    %c0_i32_0 = arith.constant 0 : i32
    %c0_i32_1 = arith.constant 0 : i32
    %c0_i32_2 = arith.constant 0 : i32
    %c0_i32_3 = arith.constant 0 : i32
    return %c0_i32, %c0_i32_0, %c0_i32_1, %c0_i32_2 : i32, i32, i32, i32
  }
  func.func @transform_6(%arg0: i32, %arg1: memref<6x8xi32, #tpu.memory_space<smem>>) -> (i32, i32, i32, i32) {
    %c0_i32 = arith.constant 0 : i32
    %c0_i32_0 = arith.constant 0 : i32
    %c0_i32_1 = arith.constant 0 : i32
    %c0_i32_2 = arith.constant 0 : i32
    %c0_i32_3 = arith.constant 0 : i32
    return %c0_i32, %c0_i32_0, %c0_i32_1, %c0_i32_2 : i32, i32, i32, i32
  }
  func.func @transform_7(%arg0: i32, %arg1: memref<6x8xi32, #tpu.memory_space<smem>>) -> (i32, i32, i32) {
    %c0_i32 = arith.constant 0 : i32
    %c0_i32_0 = arith.constant 0 : i32
    %c0_i32_1 = arith.constant 0 : i32
    %c0_i32_2 = arith.constant 0 : i32
    return %c0_i32, %c0_i32_0, %c0_i32_1 : i32, i32, i32
  }
  func.func @transform_8(%arg0: i32, %arg1: memref<6x8xi32, #tpu.memory_space<smem>>) -> (i32, i32) {
    %c0_i32 = arith.constant 0 : i32
    %c0_i32_0 = arith.constant 0 : i32
    %c0_i32_1 = arith.constant 0 : i32
    return %c0_i32, %c0_i32_0 : i32, i32
  }
  func.func @transform_9(%arg0: i32, %arg1: memref<6x8xi32, #tpu.memory_space<smem>>) -> (i32, i32) {
    %c0_i32 = arith.constant 0 : i32
    %c0_i32_0 = arith.constant 0 : i32
    %c0_i32_1 = arith.constant 0 : i32
    return %c0_i32, %c0_i32_0 : i32, i32
  }
  func.func @transform_10(%arg0: i32, %arg1: memref<6x8xi32, #tpu.memory_space<smem>>) -> (i32, i32) {
    %c0_i32 = arith.constant 0 : i32
    %c0_i32_0 = arith.constant 0 : i32
    %c0_i32_1 = arith.constant 0 : i32
    return %c0_i32, %c0_i32_0 : i32, i32
  }
  func.func @transform_11(%arg0: i32, %arg1: memref<6x8xi32, #tpu.memory_space<smem>>) -> (i32, i32, i32) {
    %c0_i32 = arith.constant 0 : i32
    %c0_i32_0 = arith.constant 0 : i32
    %c0_i32_1 = arith.constant 0 : i32
    return %arg0, %c0_i32, %c0_i32_0 : i32, i32, i32
  }
  func.func @transform_12(%arg0: i32, %arg1: memref<6x8xi32, #tpu.memory_space<smem>>) -> (i32, i32, i32) {
    %c0_i32 = arith.constant 0 : i32
    %c0_i32_0 = arith.constant 0 : i32
    %c0_i32_1 = arith.constant 0 : i32
    %c0_i32_2 = arith.constant 0 : i32
    return %c0_i32, %c0_i32_0, %c0_i32_1 : i32, i32, i32
  }
}

</mosaic_0001>

<bundles_post_ra>
// kernel: tpu_custom_call.1
= control target key start
LH: loop header
LB: loop body
LE: loop exit
PB: predicated region body
PF: predicated region fallthrough
CT: control target
= control target key end

     0   :  { %s2366_s28 = smov [#allocation4]   ;;  %s2860_s0 = inlined_call_operand.hbm [shape: s32[6,8], index: 0, kind: input, shape index: {}]   ;;  %s2861_s1 = inlined_call_operand.vmem [shape: f32[64,32], index: 1, kind: input, shape index: {}]   ;;  %s2862_s2 = inlined_call_operand.hbm [shape: f32[2,8,32], index: 2, kind: input, shape index: {}]   ;;  %s2863_s3 = inlined_call_operand.vmem [shape: f32[8,8,32], index: 3, kind: input, shape index: {}]   ;;  %s2864_s4 = inlined_call_operand.hbm [shape: f32[2,3,32,32], index: 4, kind: input, shape index: {}]   ;;  %s2865_s5 = inlined_call_operand.hbm [shape: f32[2,3,32,32], index: 5, kind: input, shape index: {}]   ;;  %s2866_s6 = inlined_call_operand.hbm [shape: f32[2,3,1,32], index: 6, kind: input, shape index: {}]   ;;  %s2867_s7 = inlined_call_operand.hbm [shape: f32[2,3,1,32], index: 7, kind: input, shape index: {}]   ;;  %s2868_s8 = inlined_call_operand.hbm [shape: f32[2,32,32], index: 8, kind: input, shape index: {}]   ;;  %s2869_s9 = inlined_call_operand.vmem [shape: f32[1,32], index: 9, kind: input, shape index: {}]   ;;  %s2870_s10 = inlined_call_operand.vmem [shape: f32[32,128], index: 10, kind: input, shape index: {}]   ;;  %s2871_s11 = inlined_call_operand.vmem [shape: f32[1,128], index: 11, kind: input, shape index: {}]   ;;  %s2872_s12 = inlined_call_operand.hbm [shape: f32[6,8,128], index: 12, kind: output, shape index: {0}]   ;;  %s2873_s13 = inlined_call_operand.hbm [shape: f32[2,8,32], index: 13, kind: output, shape index: {1}]  }
   0x1   :  { %2882 = sst [smem:[#allocation32_spill]] %s2864_s4  ;;  %s20_s27 = sshll.u32 %s2860_s0, 4  ;;  %s21_s27 = int_to_ptr.hbm [resolvable:$true] %s20_s27 }
   0x2   :  { %2883 = sst [smem:[#allocation33_spill]] %s2866_s6 }
   0x3   :  { %2884 = sst [smem:[#allocation34_spill]] %s2872_s12 }
   0x4   :  { %23 = dma.hbm_to_smem %s21_s27, 128, %s2366_s28, [#allocation3] }
   0x5   :  { %2324 = dma.done.wait [#allocation3], 128 }
   0x6   :  { %2325 = vsyncadd [#allocation3], 4294967168 }
   0x7   :  { %26 = sfence }
   0x8   :  { %27 = vsyncpa [#allocation6], 0 }
   0x9   :  { %28 = vsyncpa [#allocation9], 0 }
   0xa   :  { %29 = vsyncpa [#allocation12], 0 }
   0xb   :  { %30 = vsyncpa [#allocation15], 0 }
   0xc   :  { %31 = vsyncpa [#allocation7], 0 }
   0xd   :  { %33 = vsyncpa [#allocation7 + $0x1], 0 }
   0xe   :  { %34 = vsyncpa [#allocation18], 0  ;;  %s2453_s29 = smov 0   ;;  %s2455_s30 = smov 0  }
   0xf   :  { %s2457_s14 = smov 0   ;;  %s2459_s0 = smov 0  }
  0x10 LB: > { %2885 = sst [smem:[#allocation26_spill]] %s2352_s29  ;;  %s2474_s15 = sadd.s32 4294967295, %s2364_s0   ;;  %s2364_s0 = sphi %s2459_s0, %s2902_s0   ;;  %s2360_s14 = sphi %s2457_s14, %s2904_s14   ;;  %s2356_s30 = sphi %s2455_s30, %s2906_s30   ;;  %s2352_s29 = sphi %s2453_s29, %s2905_s29  }
  0x11   : > { %2886 = sst [smem:[#allocation27_spill]] %s2360_s14  ;;  %s1821_s16 = sadd.s32 4294967294, %s2364_s0  }
  0x12   : > { %2887 = sst [smem:[#allocation28_spill]] %s2364_s0  ;;  %s2478_s17 = sadd.s32 1, %s2364_s0  }
  0x13   : > { %2888 = sst [smem:[#allocation29_spill]] %s2478_s17  ;;  %s278_s18 = sadd.s32 1, %s2360_s14 }
  0x14   : > { %s275_s19 = ssub.s32 %s2364_s0, %s2478_s17  ;;  %p288_p0 = scmp.ne.s32.totalorder %s2360_s14, %s2356_s30 }
  0x15   : > { %p276_p1 = scmp.eq.s32.totalorder %s275_s19, 0  ;;  %p289_p2 = scmp.eq.s32.totalorder %s2474_s15, 5 }
  0x16   : > { %p294_p3 = scmp.ne.s32.totalorder %s2356_s30, %s2352_s29  ;;  %p295_p4 = scmp.eq.s32.totalorder %s1821_s16, 5 }
  0x17   : > { %s2489_s20 = scalar_select %p276_p1, %s2360_s14, %s278_s18  }
  0x18   : > { %p2493_p5 = por %p289_p2, %p288_p0  ;;  %p2497_p6 = por %p295_p4, %p294_p3 }
  0x19   : > { %2889 = sst [smem:[#allocation30_spill]] %s2489_s20  ;;  %p1822_p7 = scmp.ge.s32.totalorder %s2364_s0, 1 }
  0x1a   : > { %s2891_s22 = scalar_select %p2497_p6, 1, 0 }
  0x1b   : > { %p323_p8 = scmp.lt.s32.totalorder %s2364_s0, 7  ;;  %p1823_p9 = scmp.ne.s32.totalorder %s2474_s15, 0 }
  0x1c   : > { %2892 = sst [smem:[#allocation31_spill]] %s2891_s22  ;;  %p1941_p10 = scmp.eq.s32.totalorder %s2474_s15, 0 }
  0x1d   : > { %p2505_p11 = pnand %p1822_p7, %p323_p8  ;;  %s2894_s4 = sld [smem:[#allocation32_spill]] }
  0x1e   : > { %s2895_s6 = sld [smem:[#allocation33_spill]]  ;;  %s2367_s19 = smov [#allocation8]  }
  0x1f   : > { %p1918_p12 = pneg %p2505_p11  ;;  %s356_s20 = sshll.u32 %s2367_s19, 4  ;;  %s357_s20 = int_to_ptr.vmem [resolvable:$true] %s356_s20 }
  0x20   : > { %s2368_s24 = smov 128   ;;  %s2369_s25 = smov 8  }
  0x21   : > { %p2519_p13 = pnand %p1941_p10, %p1918_p12  ;;  %s2370_s27 = smov [#allocation11]  }
  0x22   : > { %s384_s28 = sshll.u32 %s2370_s27, 4  ;;  %s337_s17 = sshll.u32 %s2862_s2, 4  ;;  %s385_s28 = int_to_ptr.vmem [resolvable:$true] %s384_s28  ;;  %s338_s17 = int_to_ptr.hbm [resolvable:$true] %s337_s17 }
  0x23   : > { %s354_s26 = sshll.u32 %s2894_s4, 4  ;;  %s2371_s4 = smov 16   ;;  %s355_s26 = int_to_ptr.hbm [resolvable:$true] %s354_s26 }
  0x24   : > { %s382_s16 = sshll.u32 %s2895_s6, 4  ;;  %s2372_s6 = smov 1   ;;  %s383_s16 = int_to_ptr.hbm [resolvable:$true] %s382_s16 }
  0x25   : > { %1924 = dma.hbm_to_vmem [thread:$0]  (!%p2519_p13), %s355_s26, 3072, %s357_s20, [#allocation9], %s2368_s24, %s2368_s24, %s2369_s25  }
  0x26   : > { %1930 = dma.hbm_to_vmem [thread:$0]  (!%p2519_p13), %s383_s16, 96, %s385_s28, [#allocation12], %s2371_s4, %s2371_s4, %s2372_s6  }
  0x27   : > { %s2373_s22 = smov [#allocation5]   ;;  %s368_s20 = sshll.u32 %s2865_s5, 4  ;;  %s369_s20 = int_to_ptr.hbm [resolvable:$true] %s368_s20 }
  0x28   : > { %s339_s29 = sshll.u32 %s2373_s22, 4  ;;  %s2374_s26 = smov [#allocation10]   ;;  %s340_s29 = int_to_ptr.vmem [resolvable:$true] %s339_s29 }
  0x29   : > { %1921 = dma.hbm_to_vmem [thread:$0]  (!%p2519_p13), %s338_s17, 256, %s340_s29, [#allocation6], %s2368_s24, %s2368_s24, %s2369_s25  }
  0x2a   : > { %s370_s16 = sshll.u32 %s2374_s26, 4  ;;  %s396_s28 = sshll.u32 %s2867_s7, 4  ;;  %s371_s16 = int_to_ptr.vmem [resolvable:$true] %s370_s16  ;;  %s397_s28 = int_to_ptr.hbm [resolvable:$true] %s396_s28 }
  0x2b   : > { %1927 = dma.hbm_to_vmem [thread:$0]  (!%p2519_p13), %s369_s20, 3072, %s371_s16, [#allocation9], %s2368_s24, %s2368_s24, %s2369_s25  }
  0x2c   : > { %s410_s22 = sshll.u32 %s2868_s8, 4  ;;  %s2375_s29 = smov [#allocation13]   ;;  %s411_s22 = int_to_ptr.hbm [resolvable:$true] %s410_s22 }
  0x2d   : > { %s398_s17 = sshll.u32 %s2375_s29, 4  ;;  %s2376_s19 = smov [#allocation14]   ;;  %s399_s17 = int_to_ptr.vmem [resolvable:$true] %s398_s17 }
  0x2e   : > { %1933 = dma.hbm_to_vmem [thread:$0]  (!%p2519_p13), %s397_s28, 96, %s399_s17, [#allocation12], %s2371_s4, %s2371_s4, %s2372_s6  }
  0x2f   : > { %s412_s26 = sshll.u32 %s2376_s19, 4  ;;  %437 = sbr.rel (%p2505_p11) target bundleno = 1529 (0x5f9), region = 64  ;;  %s413_s26 = int_to_ptr.vmem [resolvable:$true] %s412_s26 }
  0x30   : > { %1936 = dma.hbm_to_vmem [thread:$0]  (!%p2519_p13), %s411_s22, 1024, %s413_s26, [#allocation15], %s2368_s24, %s2368_s24, %s2369_s25  }
  0x34   : > { %2327 = dma.done.wait (%p1941_p10), [#allocation6], 256  }
  0x35   : > { %2329 = vsyncadd (%p1941_p10), [#allocation6], 4294967040 }
  0x36   : > { %2331 = dma.done.wait (%p1941_p10), [#allocation9], 6144  }
  0x37   : > { %2333 = vsyncadd (%p1941_p10), [#allocation9], 4294961152 }
  0x38   : > { %2335 = dma.done.wait (%p1941_p10), [#allocation12], 192  }
  0x39   : > { %2337 = vsyncadd (%p1941_p10), [#allocation12], 4294967104 }
  0x3a   : > { %2339 = dma.done.wait (%p1941_p10), [#allocation15], 1024  }
  0x3b   : > { %2341 = vsyncadd (%p1941_p10), [#allocation15], 4294966272  ;;  %s2881_s4 = sand.u32 1, %s2356_s30   ;;  %503 = sbr.rel (%p1823_p9) target bundleno = 67 (0x43), region = 92 }
  0x3c   : > { %s2580_s6 = sshll.u32 %s2881_s4, 3 }
  0x3d   : > { %s497_s23 = scalar_lea.vmem [#allocation16], %s2580_s6 }
  0x40   : > { %v504_v0 = vld [vmem:[#allocation5] sm:$0xff]  ;;  %vm506_vm0 = vcmask 261120   ;;  %v505_v1 = vld [vmem:[#allocation5 + $0x8] sm:$0xff] }
  0x41   : > { %507 = vst.msk [vmem:[#allocation17] sm:$0xff] %vm506_vm0, %v504_v0 }
  0x42   : > { %508 = vst.msk [vmem:[#allocation17 + $0x8] sm:$0xff] %vm506_vm0, %v505_v1 }
  0x43 PF: > { %v647_v2 = vld [vmem:[#allocation10 + $0x18] sm:$0xff]  ;;  %v646_v3 = vld [vmem:[#allocation10 + $0x10] sm:$0xff]  ;;  %s2586_s18 = sshll.u32 %s2474_s15, 7  ;;  %v645_v5 = vld [vmem:[#allocation10 + $0x8] sm:$0xff]  ;;  %vm560_vm1 = vcmask 261120   ;;  %vm513_vm2 = vcmask 253952  }
  0x44   : > { %667 = vmatpush.msra.mxu3 %v647_v2  ;;  %v555_v4 = vld [vmem:[#allocation8 + $0x18] sm:$0xff]  ;;  %s2589_s24 = sld [smem:[#allocation4 + %s2586_s18]]  ;;  %s515_s25 = sadd.s32 1, %s2586_s18  ;;  %v554_v6 = vld [vmem:[#allocation8 + $0x10] sm:$0xff]  ;;  %v553_v7 = vld [vmem:[#allocation8 + $0x8] sm:$0xff] }
  0x45   : > { %576 = vmatpush.msra.mxu0 %v555_v4  ;;  %s2592_s20 = sld [smem:[#allocation4 + %s515_s25]]  ;;  %s520_s16 = sadd.s32 2, %s2586_s18  ;;  %v588_v8 = vld [vmem:[#allocation8 + $0x38] sm:$0xff]  ;;  %v587_v9 = vld [vmem:[#allocation8 + $0x30] sm:$0xff]  ;;  %v644_v10 = vld [vmem:[#allocation10] sm:$0xff] }
  0x46   : > { %668 = vmatpush.msra.mxu3 %v646_v3  ;;  %s2595_s14 = sld [smem:[#allocation4 + %s520_s16]]  ;;  %s525_s27 = sadd.s32 3, %s2586_s18  ;;  %606 = vmatpush.msra.mxu1 %v588_v8  ;;  %v552_v12 = vld [vmem:[#allocation8] sm:$0xff]  ;;  %v618_v13 = vld [vmem:[#allocation8 + $0x58] sm:$0xff]  ;;  %v586_v15 = vld [vmem:[#allocation8 + $0x28] sm:$0xff] }
  0x47   : > { %577 = vmatpush.msra.mxu0 %v554_v6  ;;  %s2598_s28 = sld [smem:[#allocation4 + %s525_s27]]  ;;  %s530_s12 = sadd.s32 4, %s2586_s18  ;;  %v679_v14 = vld [vmem:[#allocation10 + $0x38] sm:$0xff]  ;;  %v678_v16 = vld [vmem:[#allocation10 + $0x30] sm:$0xff]  ;;  %v585_v17 = vld [vmem:[#allocation8 + $0x20] sm:$0xff]  ;;  %636 = vmatpush.msra.mxu2 %v618_v13 }
  0x48   : > { %669 = vmatpush.msra.mxu3 %v645_v5  ;;  %v2601_v11 = vld [vmem:[#allocation17] sm:$0xff]  ;;  %s2603_s0 = sld [smem:[#allocation4 + %s530_s12]]  ;;  %s535_s22 = sadd.s32 5, %s2586_s18  ;;  %607 = vmatpush.msra.mxu1 %v587_v9  ;;  %v617_v18 = vld [vmem:[#allocation8 + $0x50] sm:$0xff]  ;;  %v677_v20 = vld [vmem:[#allocation10 + $0x28] sm:$0xff] }
  0x49   : > { %578 = vmatpush.msra.mxu0 %v553_v7  ;;  %s2606_s29 = sld [smem:[#allocation4 + %s535_s22]]  ;;  %s540_s17 = sadd.s32 6, %s2586_s18  ;;  %v709_v21 = vld [vmem:[#allocation10 + $0x58] sm:$0xff]  ;;  %v616_v23 = vld [vmem:[#allocation8 + $0x48] sm:$0xff]  ;;  %v676_v25 = vld [vmem:[#allocation10 + $0x20] sm:$0xff]  ;;  %637 = vmatpush.msra.mxu2 %v617_v18 }
  0x4a   : > { %670 = vmatpush.msra.mxu3 %v644_v10  ;;  %s511_s25 = scalar_lea.vmem %s2861_s1, %s2589_s24  ;;  %s2613_s16 = sld [smem:[#allocation4 + %s540_s17]]  ;;  %608 = vmatpush.msra.mxu1 %v586_v15  ;;  %v708_v26 = vld [vmem:[#allocation10 + $0x50] sm:$0xff]  ;;  %v615_v27 = vld [vmem:[#allocation8 + $0x40] sm:$0xff]  ;;  %v707_v29 = vld [vmem:[#allocation10 + $0x48] sm:$0xff] }
  0x4b   : > { %1842 = vmatmul.msk.f32.vlgmr.msra.gmra.mxu3 %vm560_vm1, %v2601_v11  ;;  %579 = vmatpush.msra.mxu0 %v552_v12  ;;  %v512_v19 = vld [vmem:[%s511_s25] sm:$0x1]  ;;  %s517_s22 = scalar_lea.vmem %s2861_s1, %s2592_s20  ;;  %s545_s4 = sadd.s32 7, %s2586_s18  ;;  %v706_v32 = vld [vmem:[#allocation10 + $0x40] sm:$0xff]  ;;  %v789_v47 = vld [vmem:[#allocation8 + $0x78] sm:$0xff] }
  0x4c   : > { %514 = vst.msk [vmem:[#allocation2] sm:$0x1] %vm513_vm2, %v512_v19  ;;  %v518_v22 = vld [vmem:[%s517_s22] sm:$0x1]  ;;  %s522_s19 = scalar_lea.vmem %s2861_s1, %s2595_s14  ;;  %s2627_s26 = sld [smem:[#allocation4 + %s545_s4]]  ;;  %609 = vmatpush.msra.mxu1 %v585_v17  ;;  %638 = vmatpush.msra.mxu2 %v616_v23  ;;  %v822_v48 = vld [vmem:[#allocation8 + $0x98] sm:$0xff] }
  0x4d   : > { %697 = vmatpush.msrb.mxu0 %v679_v14  ;;  %519 = vst.msk [vmem:[#allocation2 + $0x1] sm:$0x1] %vm513_vm2, %v518_v22  ;;  %v523_v24 = vld [vmem:[%s522_s19] sm:$0x1]  ;;  %s527_s25 = scalar_lea.vmem %s2861_s1, %s2598_s28  ;;  %v2003_v36 = vld [vmem:[#allocation13] ss:$0 sm:$0xff]  ;;  %840 = vmatpush.msrb.mxu3 %v822_v48 }
  0x4e   : > { %524 = vst.msk [vmem:[#allocation2 + $0x2] sm:$0x1] %vm513_vm2, %v523_v24  ;;  %v528_v28 = vld [vmem:[%s527_s25] sm:$0x1]  ;;  %s532_s27 = scalar_lea.vmem %s2861_s1, %s2603_s0  ;;  %727 = vmatpush.msrb.mxu1 %v709_v21  ;;  %639 = vmatpush.msra.mxu2 %v615_v27  ;;  %v2002_v38 = vld [vmem:[#allocation11] ss:$0 sm:$0xff] }
  0x4f   : > { %698 = vmatpush.msrb.mxu0 %v678_v16  ;;  %529 = vst.msk [vmem:[#allocation2 + $0x3] sm:$0x1] %vm513_vm2, %v528_v28  ;;  %v533_v30 = vld [vmem:[%s532_s27] sm:$0x1]  ;;  %s537_s22 = scalar_lea.vmem %s2861_s1, %s2606_s29  ;;  %v2004_v43 = vld [vmem:[#allocation11 + $0x1] ss:$0 sm:$0xff] }
  0x50   : > { %534 = vst.msk [vmem:[#allocation2 + $0x4] sm:$0x1] %vm513_vm2, %v533_v30  ;;  %v538_v31 = vld [vmem:[%s537_s22] sm:$0x1]  ;;  %s542_s0 = scalar_lea.vmem %s2861_s1, %s2613_s16  ;;  %728 = vmatpush.msrb.mxu1 %v708_v26  ;;  %v2005_v45 = vld [vmem:[#allocation13 + $0x1] ss:$0 sm:$0xff]  ;;  %810 = vmatpush.msrb.mxu2 %v789_v47 }
  0x51   : > { %699 = vmatpush.msrb.mxu0 %v677_v20  ;;  %539 = vst.msk [vmem:[#allocation2 + $0x5] sm:$0x1] %vm513_vm2, %v538_v31  ;;  %v543_v33 = vld [vmem:[%s542_s0] sm:$0x1]  ;;  %v852_v49 = vld [vmem:[#allocation8 + $0xb8] sm:$0xff]  ;;  %v788_v50 = vld [vmem:[#allocation8 + $0x70] sm:$0xff] }
  0x52   : > { %544 = vst.msk [vmem:[#allocation2 + $0x6] sm:$0x1] %vm513_vm2, %v543_v33  ;;  %s547_s18 = scalar_lea.vmem %s2861_s1, %s2627_s26  ;;  %729 = vmatpush.msrb.mxu1 %v707_v29  ;;  %v821_v51 = vld [vmem:[#allocation8 + $0x90] sm:$0xff]  ;;  %v787_v54 = vld [vmem:[#allocation8 + $0x68] sm:$0xff]  ;;  %811 = vmatpush.msrb.mxu2 %v788_v50  ;;  %v882_v58 = vld [vmem:[#allocation10 + $0x78] sm:$0xff]  ;;  %s2377_s0 = smov [#allocation17]  }
  0x53   : > { %700 = vmatpush.msrb.mxu0 %v676_v25  ;;  %v548_v34 = vld [vmem:[%s547_s18] sm:$0x1]  ;;  %v851_v52 = vld [vmem:[#allocation8 + $0xb0] sm:$0xff]  ;;  %841 = vmatpush.msrb.mxu3 %v821_v51  ;;  %v786_v60 = vld [vmem:[#allocation8 + $0x60] sm:$0xff]  ;;  %s1688_s19 = sshll.u32 %s2377_s0, 4  ;;  %s1690_s16 = sshll.u32 %s2873_s13, 4  ;;  %s1689_s19 = int_to_ptr.vmem [resolvable:$true] %s1688_s19  ;;  %s1691_s16 = int_to_ptr.hbm [resolvable:$true] %s1690_s16 }
  0x54   : > { %549 = vst.msk [vmem:[#allocation2 + $0x7] sm:$0x1] %vm513_vm2, %v548_v34  ;;  %730 = vmatpush.msrb.mxu1 %v706_v32  ;;  %v820_v55 = vld [vmem:[#allocation8 + $0x88] sm:$0xff]  ;;  %v819_v61 = vld [vmem:[#allocation8 + $0x80] sm:$0xff]  ;;  %812 = vmatpush.msrb.mxu2 %v787_v54  ;;  %v881_v3 = vld [vmem:[#allocation10 + $0x70] sm:$0xff]  ;;  %s2378_s26 = smov 128  }
  0x55   : > { %v850_v57 = vld [vmem:[#allocation8 + $0xa8] sm:$0xff]  ;;  %842 = vmatpush.msrb.mxu3 %v820_v55  ;;  %v849_v62 = vld [vmem:[#allocation8 + $0xa0] sm:$0xff]  ;;  %v915_v4 = vld [vmem:[#allocation10 + $0x98] sm:$0xff]  ;;  %s2379_s20 = smov 8   ;;  %s1883_s25 = sshll.u32 %s2474_s15, 3 }
  0x56   : > { %813 = vmatpush.msrb.mxu2 %v786_v60  ;;  %v880_v5 = vld [vmem:[#allocation10 + $0x68] sm:$0xff]  ;;  %v914_v6 = vld [vmem:[#allocation10 + $0x90] sm:$0xff]  ;;  %v879_v7 = vld [vmem:[#allocation10 + $0x60] sm:$0xff]  ;;  %s2897_s27 = sld [smem:[#allocation34_spill]]  ;;  %s1677_s12 = sshll.u32 %s497_s23, 4  ;;  %s1678_s12 = int_to_ptr.vmem [resolvable:$true] %s1677_s12 }
  0x57   : > { %843 = vmatpush.msrb.mxu3 %v819_v61  ;;  %v913_v8 = vld [vmem:[#allocation10 + $0x88] sm:$0xff]  ;;  %v912_v12 = vld [vmem:[#allocation10 + $0x80] sm:$0xff]  ;;  %v945_v16 = vld [vmem:[#allocation10 + $0xb8] sm:$0xff]  ;;  %s2898_s24 = sand.u32 1, %s2356_s30  }
  0x58   : > { %v2663_v9 = vld [vmem:[#allocation17 + $0x8] sm:$0xff]  ;;  %v944_v17 = vld [vmem:[#allocation10 + $0xb0] sm:$0xff]  ;;  %v2007_v25 = vld [vmem:[#allocation11 + $0x2] ss:$0 sm:$0xff]  ;;  %s1665_s17 = scalar_lea.sflag [#allocation7], %s2898_s24 }
  0x59   : > { %v2006_v18 = vld [vmem:[#allocation13 + $0x2] ss:$0 sm:$0xff]  ;;  %963 = vmatpush.msra.mxu3 %v945_v16  ;;  %v942_v27 = vld [vmem:[#allocation10 + $0xa0] sm:$0xff]  ;;  %v2011_v51 = vld [vmem:[#allocation13 + $0x3] ss:$0 sm:$0xff] }
  0x5a   : > { %v943_v22 = vld [vmem:[#allocation10 + $0xa8] sm:$0xff] }
  0x5b   : > { %v550_v35 = vld [vmem:[#allocation2] sm:$0xff]  ;;  %964 = vmatpush.msra.mxu3 %v944_v17 }
  0x5c   : > { %1839 = vmatmul.msk.f32.vlgmr.msra.gmra.mxu0 %vm560_vm1, %v550_v35  ;;  %1840 = vmatmul.msk.f32.vlgmr.msra.gmra.mxu1 %vm560_vm1, %v550_v35  ;;  %s1675_s28 = scalar_lea.hbm %s2897_s27, %s1883_s25 }
  0x5d   : > { %1841 = vmatmul.msk.f32.vlgmr.msra.gmra.mxu2 %vm560_vm1, %v550_v35  ;;  %870 = vmatpush.msra.mxu0 %v852_v49  ;;  %s1679_s22 = sshll.u32 %s1675_s28, 4  ;;  %s1680_s22 = int_to_ptr.hbm [resolvable:$true] %s1679_s22 }
  0x5e   : > { %903 = vmatpush.msra.mxu1 %v882_v58  ;;  %933 = vmatpush.msra.mxu2 %v915_v4  ;;  %s2294_s0 = sshra.s32 %s1680_s22, 4  ;;  %s2295_s0 = int_to_ptr.hbm [resolvable:$true] %s2294_s0 }
  0x5f   : > { %871 = vmatpush.msra.mxu0 %v851_v52  ;;  %965 = vmatpush.msra.mxu3 %v943_v22  ;;  %p2301_p4 = scmp.lt.s32.totalorder %s2295_s0, %s2897_s27 }
  0x60   : > { %904 = vmatpush.msra.mxu1 %v881_v3  ;;  %934 = vmatpush.msra.mxu2 %v914_v6  ;;  %v2679_v3 = vld [vmem:[%s2863_s3] sm:$0xff]  ;;  %v2691_v6 = vld [vmem:[%s2863_s3 + $0x18] sm:$0xff] }
  0x61   : > { %872 = vmatpush.msra.mxu0 %v850_v57  ;;  %966 = vmatpush.msra.mxu3 %v942_v27  ;;  %v2010_v57 = vld [vmem:[#allocation11 + $0x4] ss:$0 sm:$0xff] }
  0x62   : > { %905 = vmatpush.msra.mxu1 %v880_v5  ;;  %935 = vmatpush.msra.mxu2 %v913_v8  ;;  %v2686_v5 = vld [vmem:[%s2863_s3 + $0x10] sm:$0xff] }
  0x63   : > { %873 = vmatpush.msra.mxu0 %v849_v62  ;;  %v2707_v8 = vld [vmem:[%s2863_s3 + $0x30] sm:$0xff] }
  0x64   : > { %1843 = vmatmul.msk.f32.vlgmr.msrb.gmra.mxu0 %vm560_vm1, %v2601_v11  ;;  %1844 = vmatmul.msk.f32.vlgmr.msrb.gmra.mxu1 %vm560_vm1, %v2601_v11 }
  0x65   : > { %906 = vmatpush.msra.mxu1 %v879_v7  ;;  %936 = vmatpush.msra.mxu2 %v912_v12  ;;  %v2696_v7 = vld [vmem:[%s2863_s3 + $0x8] sm:$0xff]  ;;  %v2717_v12 = vld [vmem:[%s2863_s3 + $0x20] sm:$0xff] }
  0x66   : > { %1855 = vmatpush.xpose.msk.msrb.mxu0 %vm560_vm1, %v2679_v3 }
  0x67   : > { %1857 = vmatpush.xpose.msk.msrb.mxu1 %vm560_vm1, %v2696_v7 }
  0x6c   : > { %1850 = vmatmul.msk.f32.vlgmr.msra.gmra.mxu1 %vm560_vm1, %v2663_v9 }
  0xce   : > { %v672_v37 = vpop.f32.mrf.mxu3 }
  0xcf   : > { %v673_v39 = vadd.f32 %v2003_v36, %v672_v37 }
  0xd9   : > { %v581_v40 = vpop.f32.mrf.mxu0  ;;  %v611_v44 = vpop.f32.mrf.mxu1 }
  0xda   : > { %v582_v41 = vadd.f32 %v2002_v38, %v581_v40  ;;  %v612_v53 = vadd.f32 %v2004_v43, %v611_v44 }
  0xdc   : > { %v735_v42 = vadd.f32 %v673_v39, %v582_v41 }
  0xde   : > { %v1845_v46 = vmul.f32 -1.442695, %v735_v42 }
  0xe0   : > { %2016 = vpow2.f32 %v1845_v46  ;;  %v641_v26 = vpop.f32.mrf.mxu2 }
  0xe1   : > { %v702_v56 = vpop.f32.mrf.mxu0  ;;  %v732_v20 = vpop.f32.mrf.mxu1  ;;  %v642_v34 = vadd.f32 %v2007_v25, %v641_v26 }
  0xe2   : > { %v703_v59 = vadd.f32 %v2005_v45, %v702_v56  ;;  %v733_v28 = vadd.f32 %v2006_v18, %v732_v20  ;;  %v2013_v18 = vld [vmem:[#allocation13 + $0x5] ss:$0 sm:$0xff] }
  0xe4   : > { %v755_v63 = vadd.f32 %v703_v59, %v612_v53  ;;  %v2009_v53 = vld [vmem:[#allocation11 + $0x3] ss:$0 sm:$0xff]  ;;  %v2012_v59 = vld [vmem:[#allocation13 + $0x4] ss:$0 sm:$0xff] }
  0xe6   : > { %v2017_v0 = vpop.eup %2016  ;;  %v1846_v1 = vmul.f32 -1.442695, %v755_v63 }
  0xe7   : > { %v739_v2 = vadd.f32 1.0, %v2017_v0 }
  0xe8   : > { %2018 = vpow2.f32 %v1846_v1 }
  0xe9   : > { %2020 = vrcp.f32 %v739_v2  ;;  %v751_v21 = vand.u32 2147483648, %v739_v2  ;;  %v749_v24 = vand.u32 2147483647, %v739_v2  ;;  %vm745_vm4 = vweird.f32 %v739_v2  ;;  %v908_v52 = vpop.f32.mrf.mxu1 }
  0xea   : > { %v909_v54 = vadd.f32 %v2011_v51, %v908_v52 }
  0xeb   : > { %v752_v31 = vor.u32 1.1754944e-38, %v751_v21  ;;  %vm750_vm6 = vcmp.eq.f32.partialorder %v749_v24, 8.507059e+37  ;;  %v2008_v24 = vld [vmem:[#allocation11 + $0x5] ss:$0 sm:$0xff] }
  0xee   : > { %v2019_v10 = vpop.eup %2018 }
  0xef   : > { %v2021_v13 = vpop.eup %2020  ;;  %v759_v14 = vadd.f32 1.0, %v2019_v10  ;;  %v2712_v10 = vld [vmem:[%s2863_s3 + $0x38] sm:$0xff] }
  0xf0   : > { %v741_v15 = vmul.f32 %v2021_v13, %v739_v2  ;;  %vm746_vm3 = vweird.f32 %v2021_v13 }
  0xf1   : > { %2022 = vrcp.f32 %v759_v14  ;;  %vm747_vm5 = vmor %vm745_vm4, %vm746_vm3  ;;  %v771_v38 = vand.u32 2147483648, %v759_v14  ;;  %v769_v41 = vand.u32 2147483647, %v759_v14  ;;  %vm765_vm8 = vweird.f32 %v759_v14 }
  0xf2   : > { %v742_v19 = vsub.f32 1.0, %v741_v15  ;;  %vm1244_vm4 = vcmask 1041409  }
  0xf3   : > { %v772_v43 = vor.u32 1.1754944e-38, %v771_v38  ;;  %vm770_vm10 = vcmp.eq.f32.partialorder %v769_v41, 8.507059e+37 }
  0xf4   : > { %v743_v23 = vmul.f32 %v2021_v13, %v742_v19 }
  0xf6   : > { %v744_v29 = vadd.f32 %v2021_v13, %v743_v23 }
  0xf7   : > { %v2023_v30 = vpop.eup %2022 }
  0xf8   : > { %v761_v32 = vmul.f32 %v2023_v30, %v759_v14  ;;  %v748_v33 = vsel %vm747_vm5, %v2021_v13, %v744_v29  ;;  %vm766_vm7 = vweird.f32 %v2023_v30  ;;  %v2726_v13 = vld [vmem:[%s2863_s3 + $0x28] sm:$0xff]  ;;  %vm1247_vm5 = vcmask 1042434  }
  0xf9   : > { %v753_v35 = vsel %vm750_vm6, %v752_v31, %v748_v33  ;;  %vm767_vm9 = vmor %vm765_vm8, %vm766_vm7  ;;  %1865 = vmatpush.xpose.msk.msra.mxu1 %vm560_vm1, %v2726_v13  ;;  %vm1250_vm6 = vcmask 1043459   ;;  %vm1253_vm7 = vcmask 1044484   ;;  %vm1256_vm8 = vcmask 1045509  }
  0xfa   : > { %v762_v36 = vsub.f32 1.0, %v761_v32  ;;  %v775_v37 = vmul.f32 %v753_v35, %v733_v28 }
  0xfc   : > { %v776_v39 = vadd.f32 %v775_v37, %v642_v34  ;;  %v763_v40 = vmul.f32 %v2023_v30, %v762_v36 }
  0xfe   : > { %2024 = vtanh.f32 %v776_v39  ;;  %v764_v42 = vadd.f32 %v2023_v30, %v763_v40 }
 0x100   : > { %v768_v44 = vsel %vm767_vm9, %v2023_v30, %v764_v42  ;;  %vm1259_vm9 = vcmask 1046534  }
 0x101   : > { %v773_v45 = vsel %vm770_vm10, %v772_v43, %v768_v44  ;;  %vm1262_vm10 = vcmask 1047559  }
 0x102   : > { %v778_v46 = vsub.f32 1.0, %v773_v45  ;;  %v780_v49 = vmul.f32 %v773_v45, %v2601_v11 }
 0x104   : > { %v2025_v47 = vpop.eup %2024 }
 0x105   : > { %v779_v48 = vmul.f32 %v2025_v47, %v778_v46 }
 0x107   : > { %v781_v50 = vadd.f32 %v780_v49, %v779_v48 }
 0x109   : > { %1847 = vmatmul.msk.f32.vlgmr.msrb.gmra.mxu2 %vm560_vm1, %v781_v50  ;;  %782 = vst.msk [vmem:[#allocation17] sm:$0xff] %vm560_vm1, %v781_v50  ;;  %1848 = vmatmul.msk.f32.vlgmr.msrb.gmra.mxu3 %vm560_vm1, %v781_v50 }
 0x10a   : > { %1849 = vmatmul.msk.f32.vlgmr.msra.gmra.mxu0 %vm560_vm1, %v781_v50  ;;  %1859 = vmatpush.xpose.msk.msrb.mxu2 %vm560_vm1, %v2686_v5 }
 0x10b   : > { %1861 = vmatpush.xpose.msk.msrb.mxu3 %vm560_vm1, %v2691_v6  ;;  %1863 = vmatpush.xpose.msk.msra.mxu0 %vm560_vm1, %v2717_v12 }
 0x111   : > { %1851 = vmatmul.msk.f32.vlgmr.msra.gmra.mxu2 %vm560_vm1, %v2663_v9  ;;  %1852 = vmatmul.msk.f32.vlgmr.msra.gmra.mxu3 %vm560_vm1, %v2663_v9 }
 0x112   : > { %1867 = vmatpush.xpose.msk.msra.mxu2 %vm560_vm1, %v2707_v8  ;;  %1869 = vmatpush.xpose.msk.msra.mxu3 %vm560_vm1, %v2712_v10 }
 0x187   : > { %v875_v28 = vpop.f32.mrf.mxu0 }
 0x188   : > { %v876_v33 = vadd.f32 %v2008_v24, %v875_v28 }
 0x18c   : > { %v815_v11 = vpop.f32.mrf.mxu2  ;;  %v845_v60 = vpop.f32.mrf.mxu3 }
 0x18d   : > { %v816_v55 = vadd.f32 %v2009_v53, %v815_v11  ;;  %v846_v62 = vadd.f32 %v2010_v57, %v845_v60 }
 0x18f   : > { %v971_v56 = vadd.f32 %v909_v54, %v816_v55 }
 0x191   : > { %v1853_v58 = vmul.f32 -1.442695, %v971_v56 }
 0x193   : > { %2026 = vpow2.f32 %v1853_v58 }
 0x194   : > { %v938_v61 = vpop.f32.mrf.mxu2  ;;  %v968_v20 = vpop.f32.mrf.mxu3 }
 0x195   : > { %v939_v63 = vadd.f32 %v2012_v59, %v938_v61  ;;  %v969_v25 = vadd.f32 %v2013_v18, %v968_v20 }
 0x197   : > { %v991_v0 = vadd.f32 %v939_v63, %v846_v62 }
 0x199   : > { %v2027_v1 = vpop.eup %2026  ;;  %v1854_v2 = vmul.f32 -1.442695, %v991_v0 }
 0x19a   : > { %v975_v4 = vadd.f32 1.0, %v2027_v1 }
 0x19b   : > { %2028 = vpow2.f32 %v1854_v2 }
 0x19c   : > { %2030 = vrcp.f32 %v975_v4  ;;  %v987_v21 = vand.u32 2147483648, %v975_v4  ;;  %v985_v23 = vand.u32 2147483647, %v975_v4  ;;  %vm981_vm12 = vweird.f32 %v975_v4 }
 0x19e   : > { %v988_v29 = vor.u32 1.1754944e-38, %v987_v21  ;;  %vm986_vm14 = vcmp.eq.f32.partialorder %v985_v23, 8.507059e+37 }
 0x1a1   : > { %v2029_v14 = vpop.eup %2028 }
 0x1a2   : > { %v2031_v15 = vpop.eup %2030  ;;  %v995_v16 = vadd.f32 1.0, %v2029_v14 }
 0x1a3   : > { %v977_v17 = vmul.f32 %v2031_v15, %v975_v4  ;;  %vm982_vm11 = vweird.f32 %v2031_v15 }
 0x1a4   : > { %2032 = vrcp.f32 %v995_v16  ;;  %vm983_vm13 = vmor %vm981_vm12, %vm982_vm11  ;;  %v1007_v36 = vand.u32 2147483648, %v995_v16  ;;  %v1005_v38 = vand.u32 2147483647, %v995_v16  ;;  %vm1001_vm0 = vweird.f32 %v995_v16 }
 0x1a5   : > { %v978_v19 = vsub.f32 1.0, %v977_v17  ;;  %vm1265_vm11 = vcmask 64512  }
 0x1a6   : > { %v1008_v41 = vor.u32 1.1754944e-38, %v1007_v36  ;;  %vm1006_vm3 = vcmp.eq.f32.partialorder %v1005_v38, 8.507059e+37 }
 0x1a7   : > { %v979_v22 = vmul.f32 %v2031_v15, %v978_v19 }
 0x1a9   : > { %v980_v26 = vadd.f32 %v2031_v15, %v979_v22 }
 0x1aa   : > { %v2033_v27 = vpop.eup %2032 }
 0x1ab   : > { %v997_v30 = vmul.f32 %v2033_v27, %v995_v16  ;;  %v984_v31 = vsel %vm983_vm13, %v2031_v15, %v980_v26  ;;  %vm1002_vm15 = vweird.f32 %v2033_v27 }
 0x1ac   : > { %v989_v32 = vsel %vm986_vm14, %v988_v29, %v984_v31  ;;  %vm1003_vm2 = vmor %vm1001_vm0, %vm1002_vm15 }
 0x1ad   : > { %v998_v34 = vsub.f32 1.0, %v997_v30  ;;  %v1011_v35 = vmul.f32 %v989_v32, %v969_v25 }
 0x1af   : > { %v999_v37 = vmul.f32 %v2033_v27, %v998_v34  ;;  %v1012_v39 = vadd.f32 %v1011_v35, %v876_v33 }
 0x1b1   : > { %v1000_v40 = vadd.f32 %v2033_v27, %v999_v37  ;;  %2034 = vtanh.f32 %v1012_v39 }
 0x1b3   : > { %v1004_v42 = vsel %vm1003_vm2, %v2033_v27, %v1000_v40 }
 0x1b4   : > { %v1009_v43 = vsel %vm1006_vm3, %v1008_v41, %v1004_v42 }
 0x1b5   : > { %v1014_v44 = vsub.f32 1.0, %v1009_v43  ;;  %v1016_v47 = vmul.f32 %v1009_v43, %v2663_v9 }
 0x1b7   : > { %v2035_v45 = vpop.eup %2034 }
 0x1b8   : > { %v1015_v46 = vmul.f32 %v2035_v45, %v1014_v44 }
 0x1ba   : > { %v2733_v48 = vadd.f32 %v1016_v47, %v1015_v46 }
 0x1bc   : > { %1018 = vst.msk [vmem:[#allocation17 + $0x8] sm:$0xff] %vm560_vm1, %v2733_v48  ;;  %1856 = vmatmul.msk.f32.vlgmr.msrb.gmra.mxu0 %vm560_vm1, %v2733_v48  ;;  %v1028_v49 = vrot.slane %v2733_v48, 1  ;;  %v1029_v50 = vrot.slane %v2733_v48, 2  ;;  %v1030_v51 = vrot.slane %v2733_v48, 3  ;;  %v1031_v9 = vrot.slane %v2733_v48, 4 }
 0x1bd   : > { %1378 = vmatpush.msrb.mxu0 %v2679_v3  ;;  %v1032_v52 = vrot.slane %v2733_v48, 5  ;;  %v1033_v53 = vrot.slane %v2733_v48, 6  ;;  %v1034_v54 = vrot.slane %v2733_v48, 7  ;;  %1914 = dma.vmem_to_hbm [thread:$0]  (%p289_p2), %s1689_s19, 256, %s1691_s16, [#allocation18], %s2378_s26, %s2378_s26, %s2379_s20  }
 0x1be   : > { %1858 = vmatmul.msk.f32.vlgmr.msrb.gmra.mxu1 %vm560_vm1, %v1028_v49  ;;  %1860 = vmatmul.msk.f32.vlgmr.msrb.gmra.mxu2 %vm560_vm1, %v1029_v50  ;;  %s2296_s19 = scalar_lea.hbm %s2295_s0, 8  ;;  %s2300_s16 = scalar_lea.hbm %s2897_s27, 48 }
 0x1bf   : > { %1862 = vmatmul.msk.f32.vlgmr.msrb.gmra.mxu3 %vm560_vm1, %v1030_v51  ;;  %1424 = vmatpush.msrb.mxu2 %v2686_v5  ;;  %p2297_p0 = scmp.ne.s32.totalorder %s2295_s0, %s2296_s19  ;;  %p2302_p7 = scmp.lt.s32.totalorder %s2300_s16, %s2296_s19 }
 0x1c0   : > { %1447 = vmatpush.msrb.mxu3 %v2691_v6  ;;  %1401 = vmatpush.msrb.mxu1 %v2696_v7 }
 0x1c1   : > { %p2298_p1 = pnand %p2297_p0, %p2493_p5  ;;  %p2303_p8 = por %p2302_p7, %p2301_p4 }
 0x1c3   : > { %p2299_p3 = pneg %p2298_p1 }
 0x1c4   : > { %1864 = vmatmul.msk.f32.vlgmr.msra.gmra.mxu0 %vm560_vm1, %v1031_v9 }
 0x1c5   : > { %1470 = vmatpush.msra.mxu0 %v2717_v12  ;;  %p2304_p9 = pnand %p2303_p8, %p2299_p3 }
 0x1c6   : > { %1866 = vmatmul.msk.f32.vlgmr.msra.gmra.mxu1 %vm560_vm1, %v1032_v52  ;;  %1868 = vmatmul.msk.f32.vlgmr.msra.gmra.mxu2 %vm560_vm1, %v1033_v53 }
 0x1c7   : > { %1870 = vmatmul.msk.f32.vlgmr.msra.gmra.mxu3 %vm560_vm1, %v1034_v54  ;;  %1516 = vmatpush.msra.mxu2 %v2707_v8 }
 0x1c8   : > { %1539 = vmatpush.msra.mxu3 %v2712_v10  ;;  %1493 = vmatpush.msra.mxu1 %v2726_v13 }
 0x239   : > { %v1057_v11 = vpop.f32.mrf.mxu0 }
 0x23b   : > { %v1082_v55 = vpop.f32.mrf.mxu1 }
 0x23c   : > { %v1243_v56 = vrot.slane %v1082_v55, 7 }
 0x23e   : > { %v1245_v60 = vsel %vm1244_vm4, %v1243_v56, %v1057_v11 }
 0x241   : > { %v1107_v57 = vpop.f32.mrf.mxu2  ;;  %v1157_v62 = vpop.f32.mrf.mxu0 }
 0x242   : > { %v1246_v58 = vrot.slane %v1107_v57, 6  ;;  %v1132_v59 = vpop.f32.mrf.mxu3  ;;  %v1252_v2 = vrot.slane %v1157_v62, 4 }
 0x243   : > { %v1249_v61 = vrot.slane %v1132_v59, 5  ;;  %v1182_v0 = vpop.f32.mrf.mxu1 }
 0x244   : > { %v1248_v63 = vsel %vm1247_vm5, %v1246_v58, %v1245_v60  ;;  %v1255_v3 = vrot.slane %v1182_v0, 3 }
 0x245   : > { %v1251_v1 = vsel %vm1250_vm6, %v1249_v61, %v1248_v63 }
 0x246   : > { %v1254_v4 = vsel %vm1253_vm7, %v1252_v2, %v1251_v1 }
 0x247   : > { %v1257_v10 = vsel %vm1256_vm8, %v1255_v3, %v1254_v4 }
 0x249   : > { %v1207_v5 = vpop.f32.mrf.mxu2 }
 0x24a   : > { %v1258_v6 = vrot.slane %v1207_v5, 2  ;;  %v1232_v7 = vpop.f32.mrf.mxu3 }
 0x24b   : > { %v1261_v8 = vrot.slane %v1232_v7, 1 }
 0x24c   : > { %v1260_v12 = vsel %vm1259_vm9, %v1258_v6, %v1257_v10  ;;  %v1547_v6 = vld [vmem:[#allocation14 + $0x18] sm:$0xff] }
 0x24d   : > { %v1263_v13 = vsel %vm1262_vm10, %v1261_v8, %v1260_v12  ;;  %v1546_v8 = vld [vmem:[#allocation14 + $0x10] sm:$0xff] }
 0x24e   : > { %v1266_v14 = vsel %vm1265_vm11, %v1263_v13, -inf  ;;  %v1545_v13 = vld [vmem:[#allocation14 + $0x8] sm:$0xff] }
 0x24f   : > { %1267 = vmax.xlane.f32.xlu0 %v1266_v14 }
 0x2c2   : > { %v1268_v15 = vpop.xlane.xlu0 %1267 }
 0x2c3   : > { %v1270_v16 = vrot.slane %v1268_v15, 1  ;;  %v1271_v17 = vrot.slane %v1268_v15, 2  ;;  %v1272_v18 = vrot.slane %v1268_v15, 3  ;;  %v1273_v19 = vrot.slane %v1268_v15, 4 }
 0x2c4   : > { %v1274_v20 = vrot.slane %v1268_v15, 5  ;;  %v1285_v21 = vsub.f32 %v1057_v11, %v1268_v15  ;;  %v1275_v22 = vrot.slane %v1268_v15, 6  ;;  %v1276_v23 = vrot.slane %v1268_v15, 7 }
 0x2c5   : > { %v1286_v24 = vsub.f32 %v1082_v55, %v1270_v16  ;;  %v1287_v25 = vsub.f32 %v1107_v57, %v1271_v17  ;;  %v1288_v26 = vsub.f32 %v1132_v59, %v1272_v18  ;;  %v1289_v27 = vsub.f32 %v1157_v62, %v1273_v19  ;;  %v1544_v16 = vld [vmem:[#allocation14] sm:$0xff] }
 0x2c6   : > { %v1293_v28 = vmul.f32 1.442695, %v1285_v21  ;;  %v1290_v29 = vsub.f32 %v1182_v0, %v1274_v20  ;;  %v1291_v30 = vsub.f32 %v1207_v5, %v1275_v22  ;;  %v1292_v34 = vsub.f32 %v1232_v7, %v1276_v23  ;;  %v1552_v20 = vld [vmem:[#allocation14 + $0x38] sm:$0xff]  ;;  %v1551_v21 = vld [vmem:[#allocation14 + $0x30] sm:$0xff]  ;;  %v1550_v22 = vld [vmem:[#allocation14 + $0x28] sm:$0xff] }
 0x2c7   : > { %v1295_v31 = vmul.f32 1.442695, %v1286_v24  ;;  %v1297_v32 = vmul.f32 1.442695, %v1287_v25  ;;  %v1299_v33 = vmul.f32 1.442695, %v1288_v26 }
 0x2c8   : > { %2036 = vpow2.f32 %v1293_v28  ;;  %v1301_v35 = vmul.f32 1.442695, %v1289_v27  ;;  %v1303_v36 = vmul.f32 1.442695, %v1290_v29  ;;  %v1305_v37 = vmul.f32 1.442695, %v1291_v30 }
 0x2c9   : > { %2038 = vpow2.f32 %v1295_v31  ;;  %v1307_v38 = vmul.f32 1.442695, %v1292_v34  ;;  %v1549_v23 = vld [vmem:[#allocation14 + $0x20] sm:$0xff] }
 0x2ca   : > { %2040 = vpow2.f32 %v1297_v32 }
 0x2cb   : > { %2042 = vpow2.f32 %v1299_v33 }
 0x2cc   : > { %2044 = vpow2.f32 %v1301_v35 }
 0x2cd   : > { %2046 = vpow2.f32 %v1303_v36 }
 0x2ce   : > { %v2037_v39 = vpop.eup %2036  ;;  %2048 = vpow2.f32 %v1305_v37 }
 0x2cf   : > { %v2039_v40 = vpop.eup %2038  ;;  %2050 = vpow2.f32 %v1307_v38 }
 0x2d0   : > { %v2041_v41 = vpop.eup %2040  ;;  %v1317_v42 = vrot.slane %v2039_v40, 7 }
 0x2d1   : > { %v2043_v43 = vpop.eup %2042  ;;  %v1319_v44 = vrot.slane %v2041_v41, 6 }
 0x2d2   : > { %v2045_v45 = vpop.eup %2044  ;;  %v1318_v46 = vsel %vm1244_vm4, %v1317_v42, %v2037_v39  ;;  %v1321_v47 = vrot.slane %v2043_v43, 5 }
 0x2d3   : > { %v2047_v49 = vpop.eup %2046  ;;  %v1320_v50 = vsel %vm1247_vm5, %v1319_v44, %v1318_v46  ;;  %v1323_v51 = vrot.slane %v2045_v45, 4  ;;  %v1625_v46 = vld [vmem:[%s2870_s10 + $0x10] sm:$0xff] }
 0x2d4   : > { %v2049_v9 = vpop.eup %2048  ;;  %v1322_v52 = vsel %vm1250_vm6, %v1321_v47, %v1320_v50  ;;  %v1325_v53 = vrot.slane %v2047_v49, 3  ;;  %v1624_v47 = vld [vmem:[%s2870_s10 + $0x8] sm:$0xff]  ;;  %v2014_v50 = vld [vmem:[%s2869_s9] ss:$0 sm:$0xff] }
 0x2d5   : > { %v2051_v54 = vpop.eup %2050  ;;  %v1324_v11 = vsel %vm1253_vm7, %v1323_v51, %v1322_v52  ;;  %v1327_v55 = vrot.slane %v2049_v9, 2 }
 0x2d6   : > { %v1326_v56 = vsel %vm1256_vm8, %v1325_v53, %v1324_v11  ;;  %v1329_v57 = vrot.slane %v2051_v54, 1  ;;  %v2015_v11 = vld [vmem:[%s2871_s11] ss:$0 sm:$0xff] }
 0x2d7   : > { %v1328_v58 = vsel %vm1259_vm9, %v1327_v55, %v1326_v56 }
 0x2d8   : > { %v1330_v59 = vsel %vm1262_vm10, %v1329_v57, %v1328_v58 }
 0x2d9   : > { %v1332_v60 = vsel %vm1265_vm11, %v1330_v59, 0.0 }
 0x2da   : > { %1333 = vadd.xlane.f32.xlu0 %v1332_v60 }
 0x34d   : > { %v1334_v61 = vpop.xlane.xlu0 %1333 }
 0x34e   : > { %2052 = vrcp.f32 %v1334_v61 }
 0x354   : > { %v2053_v62 = vpop.eup %2052 }
 0x355   : > { %v1352_v63 = vmul.f32 %v2053_v62, %v2037_v39  ;;  %v1337_v0 = vrot.slane %v2053_v62, 1  ;;  %v1338_v1 = vrot.slane %v2053_v62, 2  ;;  %v1339_v2 = vrot.slane %v2053_v62, 3 }
 0x356   : > { %v1340_v7 = vrot.slane %v2053_v62, 4  ;;  %v1341_v10 = vrot.slane %v2053_v62, 5  ;;  %v1342_v12 = vrot.slane %v2053_v62, 6  ;;  %v1343_v14 = vrot.slane %v2053_v62, 7 }
 0x357   : > { %1871 = vmatmul.msk.f32.vlgmr.msrb.gmra.mxu0 %vm1265_vm11, %v1352_v63  ;;  %v1353_v3 = vmul.f32 %v2039_v40, %v1337_v0  ;;  %v1354_v4 = vmul.f32 %v2041_v41, %v1338_v1  ;;  %v1355_v5 = vmul.f32 %v2043_v43, %v1339_v2 }
 0x358   : > { %v1356_v15 = vmul.f32 %v2045_v45, %v1340_v7  ;;  %v1357_v17 = vmul.f32 %v2047_v49, %v1341_v10  ;;  %v1358_v18 = vmul.f32 %v2049_v9, %v1342_v12  ;;  %v1359_v19 = vmul.f32 %v2051_v54, %v1343_v14  ;;  %1589 = vmatpush.msrb.mxu0 %v1552_v20  ;;  %v1626_v45 = vld [vmem:[%s2870_s10 + $0x18] sm:$0xff]  ;;  %v1623_v49 = vld [vmem:[%s2870_s10] sm:$0xff] }
 0x359   : > { %1872 = vmatmul.msk.f32.vlgmr.msrb.gmra.mxu1 %vm1265_vm11, %v1353_v3  ;;  %1873 = vmatmul.msk.f32.vlgmr.msrb.gmra.mxu2 %vm1265_vm11, %v1354_v4 }
 0x35a   : > { %1874 = vmatmul.msk.f32.vlgmr.msrb.gmra.mxu3 %vm1265_vm11, %v1355_v5  ;;  %1609 = vmatpush.msrb.mxu1 %v1547_v6 }
 0x35b   : > { %1590 = vmatpush.msrb.mxu0 %v1551_v21  ;;  %1646 = vmatpush.msrb.mxu2 %v1626_v45 }
 0x35c   : > { %1610 = vmatpush.msrb.mxu1 %v1546_v8 }
 0x35d   : > { %1591 = vmatpush.msrb.mxu0 %v1550_v22  ;;  %1647 = vmatpush.msrb.mxu2 %v1625_v46 }
 0x35e   : > { %1611 = vmatpush.msrb.mxu1 %v1545_v13 }
 0x35f   : > { %1875 = vmatmul.msk.f32.vlgmr.msra.gmra.mxu0 %vm1265_vm11, %v1356_v15  ;;  %1648 = vmatpush.msrb.mxu2 %v1624_v47 }
 0x360   : > { %1612 = vmatpush.msrb.mxu1 %v1544_v16  ;;  %1592 = vmatpush.msrb.mxu0 %v1549_v23 }
 0x361   : > { %1876 = vmatmul.msk.f32.vlgmr.msra.gmra.mxu1 %vm1265_vm11, %v1357_v17  ;;  %1877 = vmatmul.msk.f32.vlgmr.msra.gmra.mxu2 %vm1265_vm11, %v1358_v18 }
 0x362   : > { %1878 = vmatmul.msk.f32.vlgmr.msra.gmra.mxu3 %vm1265_vm11, %v1359_v19  ;;  %1649 = vmatpush.msrb.mxu2 %v1623_v49 }
 0x369   : > { %1880 = vmatmul.msk.f32.vlgmr.msrb.gmra.mxu1 %vm560_vm1, %v2733_v48 }
 0x3d4   : > { %v1380_v24 = vpop.f32.mrf.mxu0 }
 0x3d6   : > { %v1403_v25 = vpop.f32.mrf.mxu1 }
 0x3d7   : > { %v1561_v26 = vrot.slane %v1403_v25, 7 }
 0x3d9   : > { %v1562_v30 = vsel %vm1244_vm4, %v1561_v26, %v1380_v24 }
 0x3dc   : > { %v1426_v27 = vpop.f32.mrf.mxu2  ;;  %v1472_v32 = vpop.f32.mrf.mxu0 }
 0x3dd   : > { %v1563_v28 = vrot.slane %v1426_v27, 6  ;;  %v1449_v29 = vpop.f32.mrf.mxu3  ;;  %v1567_v35 = vrot.slane %v1472_v32, 4 }
 0x3de   : > { %v1565_v31 = vrot.slane %v1449_v29, 5  ;;  %v1495_v33 = vpop.f32.mrf.mxu1 }
 0x3df   : > { %v1564_v48 = vsel %vm1247_vm5, %v1563_v28, %v1562_v30  ;;  %v1569_v36 = vrot.slane %v1495_v33, 3 }
 0x3e0   : > { %v1566_v34 = vsel %vm1250_vm6, %v1565_v31, %v1564_v48 }
 0x3e1   : > { %v1568_v37 = vsel %vm1253_vm7, %v1567_v35, %v1566_v34 }
 0x3e2   : > { %v1570_v41 = vsel %vm1256_vm8, %v1569_v36, %v1568_v37 }
 0x3e4   : > { %v1518_v38 = vpop.f32.mrf.mxu2 }
 0x3e5   : > { %v1571_v39 = vrot.slane %v1518_v38, 2  ;;  %v1541_v40 = vpop.f32.mrf.mxu3 }
 0x3e6   : > { %v1573_v42 = vrot.slane %v1541_v40, 1  ;;  %v1614_v51 = vpop.f32.mrf.mxu1 }
 0x3e7   : > { %v1572_v43 = vsel %vm1259_vm9, %v1571_v39, %v1570_v41 }
 0x3e8   : > { %v1574_v44 = vsel %vm1262_vm10, %v1573_v42, %v1572_v43 }
 0x3e9   : > { %1879 = vmatmul.msk.f32.vlgmr.msrb.gmra.mxu0 %vm560_vm1, %v1574_v44 }
 0x466   : > { %v1594_v9 = vpop.f32.mrf.mxu0 }
 0x467   : > { %v1615_v52 = vadd.f32 %v1614_v51, %v1594_v9 }
 0x469   : > { %v1621_v53 = vadd.f32 %v2014_v50, %v1615_v52 }
 0x46b   : > { %2054 = vtanh.f32 %v1621_v53 }
 0x471   : > { %v2055_v54 = vpop.eup %2054 }
 0x472   : > { %1881 = vmatmul.msk.f32.vlgmr.msrb.gmra.mxu2 %vm560_vm1, %v2055_v54 }
 0x4f5   : > { %v1651_v55 = vpop.f32.mrf.mxu2 }
 0x4f6   : > { %v1652_v56 = vadd.f32 %v2015_v11, %v1651_v55 }
 0x4f8   : > { %1654 = vmax.xlane.f32.xlu1 %v1652_v56 }
 0x56b   : > { %v1655_v57 = vpop.xlane.xlu1 %1654 }
 0x56c   : > { %v1656_v58 = vsub.f32 %v1652_v56, %v1655_v57 }
 0x56e   : > { %v1657_v59 = vmul.f32 1.442695, %v1656_v58 }
 0x570   : > { %2056 = vpow2.f32 %v1657_v59 }
 0x576   : > { %v2057_v60 = vpop.eup %2056 }
 0x577   : > { %1659 = vadd.xlane.f32.xlu1 %v2057_v60 }
 0x5ea   : > { %v1660_v61 = vpop.xlane.xlu1 %1659 }
 0x5eb   : > { %2058 = vrcp.f32 %v1660_v61 }
 0x5f1   : > { %v2059_v62 = vpop.eup %2058 }
 0x5f2   : > { %v1662_v63 = vmul.f32 %v2059_v62, %v2057_v60 }
 0x5f4   : > { %1663 = vst [vmem:[%s497_s23] sm:$0xff] %v1662_v63 }
 0x5f5   : > { %2307 = shalt.err (!%p2304_p9)
}
 0x5f6   : > { %1912 = dma.vmem_to_hbm [thread:$0]  (%p2493_p5), %s1678_s12, 128, %s1680_s22, %s1665_s17  }
 0x5f7   : > { %2343 = dma.done.wait (%p289_p2), [#allocation18], 256  }
 0x5f8   : > { %2345 = vsyncadd (%p289_p2), [#allocation18], 4294967040 }
 0x5f9 PF: > { %s2899_s6 = sld [smem:[#allocation28_spill]] }
 0x5fa   : > { %s2900_s23 = sld [smem:[#allocation26_spill]] }
 0x5ff   : > { %p1955_p10 = scmp.ge.s32.totalorder %s2899_s6, 2 }
 0x600   : > { %s1710_s4 = sand.u32 1, %s2900_s23  }
 0x601   : > { %p1938_p11 = pnand %p1955_p10, %p2497_p6  ;;  %s1711_s14 = scalar_lea.sflag [#allocation7], %s1710_s4 }
 0x603   : > { %p1939_p12 = pneg %p1938_p11 }
 0x605   : > { %2347 = dma.done.wait (%p1939_p12), %s1711_s14, 128  }
 0x606   : > { %2349 = vsyncadd (%p1939_p12), %s1711_s14, 4294967168  ;;  %s2902_s0 = sld [smem:[#allocation29_spill]]  ;;  %s2905_s29 = smov %s2356_s30 }
 0x607   : > { %s2903_s21 = sld [smem:[#allocation27_spill]] }
 0x608   : > { %s2904_s14 = sld [smem:[#allocation30_spill]] }
 0x60c   : > { %p37_p5 = scmp.ge.s32.totalorder %s2902_s0, 8  }
 0x60d   : > { %s2906_s30 = smov %s2903_s21 }
 0x60e   :  { %39 = sbr.rel (!%p37_p5) target bundleno = 16 (0x10), region = 163 }
 0x613   :  { %1717 = vsyncpa [#allocation6], 1 }
 0x614   :  { %1719 = vsyncpa [#allocation6 + $0x1], 1 }
 0x615   :  { %1720 = vsyncpa [#allocation9], 1 }
 0x616   :  { %1721 = vsyncpa [#allocation12], 1 }
 0x617   :  { %1722 = vsyncpa [#allocation15], 1 }
 0x618   :  { %1723 = vsyncpa [#allocation7], 1 }
 0x619   :  { %1725 = vsyncpa [#allocation7 + $0x1], 1 }
 0x61a   :  { %1726 = vsyncpa [#allocation18], 1 }

</bundles_post_ra>
